<compile_context>
chip_gen: v6e
topology: v6e:2x2x1
jax: 0.10.0
libtpu: 0.0.40
codegen_flags: <defaults>
</compile_context>

<pallas_src>
import functools

import jax
import jax.numpy as jnp
from jax.experimental import pallas as pl
from jax.experimental.pallas import tpu as pltpu

EPS = 1e-5


def _round_up(x, m):
    return ((x + m - 1) // m) * m


def ffn_kernel(x_ref, w1_ref, b1_ref, w2_ref, b2_ref, gamma_ref, beta_ref,
               o_ref, *, n_hk, hk):
    x = x_ref[...]                                    # (tm, D), native dtype -> MXU
    x_f32 = x.astype(jnp.float32)
    tm, d = o_ref.shape

    # fc1 -> ReLU -> fc2, accumulated in f32.  The hidden dim is walked in
    # static chunks of `hk` columns so the (tm, hk) activation stays bounded.
    y = jnp.zeros((tm, d), jnp.float32)
    for c in range(n_hk):                             # static loop, usually 1 iter
        lo = c * hk
        h = jnp.dot(x, w1_ref[:, lo:lo + hk],
                    preferred_element_type=jnp.float32)             # (tm, hk) f32
        h = jnp.maximum(h + b1_ref[:, lo:lo + hk].astype(jnp.float32), 0.0)
        y = y + jnp.dot(h.astype(w2_ref.dtype), w2_ref[lo:lo + hk, :],
                        preferred_element_type=jnp.float32)         # (tm, D) f32

    # dropout (eval mode) -> identity; bias + residual add.
    y = y + b2_ref[...].astype(jnp.float32) + x_f32

    # One-pass LayerNorm over the feature axis: E[y] and E[y^2] in one sweep.
    inv_d = 1.0 / d
    mean = jnp.sum(y, axis=-1, keepdims=True) * inv_d
    ex2 = jnp.sum(y * y, axis=-1, keepdims=True) * inv_d
    var = jnp.maximum(ex2 - mean * mean, 0.0)
    y_hat = (y - mean) * jax.lax.rsqrt(var + EPS)
    out = (y_hat * gamma_ref[...].astype(jnp.float32)
           + beta_ref[...].astype(jnp.float32))

    o_ref[...] = out.astype(o_ref.dtype)


def _pick_tm(m):
    """MXU-shaped row tile: large (<=512), multiple of 8, and >= 2 grid steps."""
    tm = _round_up(pl.cdiv(m, 2), 8)      # keep grid length >= 2 (v7x: 2 TCs)
    return max(8, min(512, tm))


def position_wise_feed_forward(x, w1, b1, w2, b2, gamma, beta, *,
                               tm=None, h_chunk=2048):
    """x: (B, S, D); w1: (D, H); b1: (H,); w2: (H, D); b2/gamma/beta: (D,)."""
    B, S, D = x.shape
    H = w1.shape[1]
    M = B * S
    x2d = x.reshape(M, D)

    if tm is None:
        tm = _pick_tm(M)

    # Hidden-dim chunking inside the kernel (caps the (tm, H) f32 activation).
    hk = h_chunk if (H > h_chunk and H % h_chunk == 0) else H
    n_hk = H // hk

    # Biases / LN params as (1, dim) rows so they live cleanly in VMEM tiles.
    b1r = b1.reshape(1, H)
    b2r = b2.reshape(1, D)
    gr = gamma.reshape(1, D)
    br = beta.reshape(1, D)

    grid = (pl.cdiv(M, tm),)     # partial last tile handled by Pallas clipping
    kernel = functools.partial(ffn_kernel, n_hk=n_hk, hk=hk)

    cost = pl.CostEstimate(
        flops=4 * M * D * H,                           # two (M, D, H) matmuls
        transcendentals=0,
        bytes_accessed=(2 * M * D + 2 * D * H + H + 3 * D) * x.dtype.itemsize,
    )

    compiler_params = pltpu.CompilerParams(
        dimension_semantics=("parallel",),
        # Defaults (16 MiB v5e, 32 MiB v6e/v7x) reject large tiles + resident
        # weights; stay comfortably under v7x's 64 MiB physical VMEM.
        vmem_limit_bytes=56 * 1024 * 1024,
    )

    def _specs(single_buffer_weights):
        kw = {"pipeline_mode": pl.Buffered(1)} if single_buffer_weights else {}
        const = lambda shape: pl.BlockSpec(shape, lambda i: (0, 0), **kw)
        return [
            pl.BlockSpec((tm, D), lambda i: (i, 0)),   # x rows (pipelined)
            const((D, H)),                             # W1 (resident, fetched once)
            const((1, H)),                             # b1
            const((H, D)),                             # W2 (resident, fetched once)
            const((1, D)),                             # b2
            const((1, D)),                             # gamma
            const((1, D)),                             # beta
        ]

    def _call(single_buffer_weights):
        return pl.pallas_call(
            kernel,
            out_shape=jax.ShapeDtypeStruct((M, D), x.dtype),
            grid_spec=pltpu.PrefetchScalarGridSpec(
                num_scalar_prefetch=0,
                grid=grid,
                in_specs=_specs(single_buffer_weights),
                out_specs=pl.BlockSpec((tm, D), lambda i: (i, 0)),
            ),
            compiler_params=compiler_params,
            cost_estimate=cost,
        )(x2d, w1, b1r, w2, b2r, gr, br)

    try:
        # Constant-index blocks never change -> single-buffer them (halves the
        # resident weight VMEM; their DMA only ever runs once anyway).
        out2d = _call(True)
    except Exception:
        # Fallback for runtimes that don't honor pl.Buffered on pallas_call.
        out2d = _call(False)

    return out2d.reshape(B, S, D)


def reference(x, w1, b1, w2, b2, gamma, beta):
    h = jnp.maximum(x @ w1 + b1, 0.0)
    y = h @ w2 + b2 + x
    mean = jnp.mean(y, axis=-1, keepdims=True)
    var = jnp.mean((y - mean) ** 2, axis=-1, keepdims=True)
    return (y - mean) / jnp.sqrt(var + EPS) * gamma + beta


if __name__ == "__main__":
    B, S, IN_DIM, HIDDEN = 2, 8, 256, 512

    key = jax.random.PRNGKey(0)
    kx, k1, k2, k3, k4 = jax.random.split(key, 5)

    x = jax.random.normal(kx, (B, S, IN_DIM), dtype=jnp.float32)

    # Deterministic parameter init (PyTorch Linear-style uniform bounds).
    bound1 = 1.0 / (IN_DIM ** 0.5)
    w1 = jax.random.uniform(k1, (IN_DIM, HIDDEN), jnp.float32, -bound1, bound1)
    b1 = jax.random.uniform(k2, (HIDDEN,), jnp.float32, -bound1, bound1)
    bound2 = 1.0 / (HIDDEN ** 0.5)
    w2 = jax.random.uniform(k3, (HIDDEN, IN_DIM), jnp.float32, -bound2, bound2)
    b2 = jax.random.uniform(k4, (IN_DIM,), jnp.float32, -bound2, bound2)
    gamma = jnp.ones((IN_DIM,), jnp.float32)
    beta = jnp.zeros((IN_DIM,), jnp.float32)

    out = position_wise_feed_forward(x, w1, b1, w2, b2, gamma, beta)
    out = jax.block_until_ready(out)

    ref = reference(x, w1, b1, w2, b2, gamma, beta)
    assert out.shape == x.shape
    assert jnp.allclose(out, ref, atol=1e-4, rtol=1e-4), "mismatch vs reference"

    print("KERNEL_OK")
</pallas_src>

<mosaic_0001>
module attributes {stable_mosaic.version = 11 : i64} {
  func.func @ffn_kernel(%arg0: i32, %arg1: memref<8x256xf32, #tpu.memory_space<vmem>>, %arg2: memref<256x512xf32, #tpu.memory_space<vmem>>, %arg3: memref<1x512xf32, #tpu.memory_space<vmem>>, %arg4: memref<512x256xf32, #tpu.memory_space<vmem>>, %arg5: memref<1x256xf32, #tpu.memory_space<vmem>>, %arg6: memref<1x256xf32, #tpu.memory_space<vmem>>, %arg7: memref<1x256xf32, #tpu.memory_space<vmem>>, %arg8: memref<8x256xf32, #tpu.memory_space<vmem>>) attributes {dimension_semantics = [#tpu.dimension_semantics<parallel>], iteration_bounds = array<i64: 2>, scalar_prefetch = 0 : i64, scratch_operands = 0 : i64, tpu.core_type = #tpu.core_type<tc>, window_params = [{transform_indices = @transform_0, window_bounds = array<i64: 8, 256>}, {pipeline_mode = #tpu.pipeline_mode<synchronous>, transform_indices = @transform_1, window_bounds = array<i64: 256, 512>}, {pipeline_mode = #tpu.pipeline_mode<synchronous>, transform_indices = @transform_2, window_bounds = array<i64: 1, 512>}, {pipeline_mode = #tpu.pipeline_mode<synchronous>, transform_indices = @transform_3, window_bounds = array<i64: 512, 256>}, {pipeline_mode = #tpu.pipeline_mode<synchronous>, transform_indices = @transform_4, window_bounds = array<i64: 1, 256>}, {pipeline_mode = #tpu.pipeline_mode<synchronous>, transform_indices = @transform_5, window_bounds = array<i64: 1, 256>}, {pipeline_mode = #tpu.pipeline_mode<synchronous>, transform_indices = @transform_6, window_bounds = array<i64: 1, 256>}, {transform_indices = @transform_7, window_bounds = array<i64: 8, 256>}]} {
    %c0 = arith.constant 0 : index
    %c0_0 = arith.constant 0 : index
    %0 = vector.load %arg1[%c0, %c0_0] : memref<8x256xf32, #tpu.memory_space<vmem>>, vector<8x256xf32>
    %cst = arith.constant 0.000000e+00 : f32
    %1 = vector.broadcast %cst : f32 to vector<8x256xf32>
    %c0_1 = arith.constant 0 : index
    %c0_2 = arith.constant 0 : index
    %2 = vector.load %arg2[%c0_1, %c0_2] : memref<256x512xf32, #tpu.memory_space<vmem>>, vector<256x512xf32>
    %cst_3 = arith.constant dense<0.000000e+00> : vector<8x512xf32>
    %3 = tpu.matmul %0, %2, %cst_3 {dimension_numbers = #tpu.dot_dimension_numbers<[1], [0], [0], [1], [0, 0, 1, 1], [], []>} : vector<8x256xf32>, vector<256x512xf32>, vector<8x512xf32> -> vector<8x512xf32>
    %c0_4 = arith.constant 0 : index
    %c0_5 = arith.constant 0 : index
    %4 = vector.load %arg3[%c0_4, %c0_5] : memref<1x512xf32, #tpu.memory_space<vmem>>, vector<1x512xf32>
    %5 = vector.broadcast %4 : vector<1x512xf32> to vector<8x512xf32>
    %6 = arith.addf %3, %5 : vector<8x512xf32>
    %cst_6 = arith.constant 0.000000e+00 : f32
    %7 = vector.broadcast %cst_6 : f32 to vector<8x512xf32>
    %8 = arith.maximumf %6, %7 : vector<8x512xf32>
    %c0_7 = arith.constant 0 : index
    %c0_8 = arith.constant 0 : index
    %9 = vector.load %arg4[%c0_7, %c0_8] : memref<512x256xf32, #tpu.memory_space<vmem>>, vector<512x256xf32>
    %cst_9 = arith.constant dense<0.000000e+00> : vector<8x256xf32>
    %10 = tpu.matmul %8, %9, %cst_9 {dimension_numbers = #tpu.dot_dimension_numbers<[1], [0], [0], [1], [0, 0, 1, 1], [], []>} : vector<8x512xf32>, vector<512x256xf32>, vector<8x256xf32> -> vector<8x256xf32>
    %11 = arith.addf %1, %10 : vector<8x256xf32>
    %c0_10 = arith.constant 0 : index
    %c0_11 = arith.constant 0 : index
    %12 = vector.load %arg5[%c0_10, %c0_11] : memref<1x256xf32, #tpu.memory_space<vmem>>, vector<1x256xf32>
    %13 = vector.broadcast %12 : vector<1x256xf32> to vector<8x256xf32>
    %14 = arith.addf %11, %13 : vector<8x256xf32>
    %15 = arith.addf %14, %0 : vector<8x256xf32>
    %cst_12 = arith.constant dense<0.000000e+00> : vector<8xf32>
    %16 = vector.multi_reduction <add>, %15, %cst_12 [1] : vector<8x256xf32> to vector<8xf32>
    %17 = vector.shape_cast %16 : vector<8xf32> to vector<8x1xf32>
    %cst_13 = arith.constant 3.906250e-03 : f32
    %18 = vector.broadcast %cst_13 : f32 to vector<8x1xf32>
    %19 = arith.mulf %17, %18 : vector<8x1xf32>
    %20 = arith.mulf %15, %15 : vector<8x256xf32>
    %cst_14 = arith.constant dense<0.000000e+00> : vector<8xf32>
    %21 = vector.multi_reduction <add>, %20, %cst_14 [1] : vector<8x256xf32> to vector<8xf32>
    %22 = vector.shape_cast %21 : vector<8xf32> to vector<8x1xf32>
    %cst_15 = arith.constant 3.906250e-03 : f32
    %23 = vector.broadcast %cst_15 : f32 to vector<8x1xf32>
    %24 = arith.mulf %22, %23 : vector<8x1xf32>
    %25 = arith.mulf %19, %19 : vector<8x1xf32>
    %26 = arith.subf %24, %25 : vector<8x1xf32>
    %cst_16 = arith.constant 0.000000e+00 : f32
    %27 = vector.broadcast %cst_16 : f32 to vector<8x1xf32>
    %28 = arith.maximumf %26, %27 : vector<8x1xf32>
    %29 = vector.broadcast %19 : vector<8x1xf32> to vector<8x256xf32>
    %30 = arith.subf %15, %29 : vector<8x256xf32>
    %cst_17 = arith.constant 9.99999974E-6 : f32
    %31 = vector.broadcast %cst_17 : f32 to vector<8x1xf32>
    %32 = arith.addf %28, %31 : vector<8x1xf32>
    %33 = math.rsqrt %32 : vector<8x1xf32>
    %34 = vector.broadcast %33 : vector<8x1xf32> to vector<8x256xf32>
    %35 = arith.mulf %30, %34 : vector<8x256xf32>
    %c0_18 = arith.constant 0 : index
    %c0_19 = arith.constant 0 : index
    %36 = vector.load %arg6[%c0_18, %c0_19] : memref<1x256xf32, #tpu.memory_space<vmem>>, vector<1x256xf32>
    %37 = vector.broadcast %36 : vector<1x256xf32> to vector<8x256xf32>
    %38 = arith.mulf %35, %37 : vector<8x256xf32>
    %c0_20 = arith.constant 0 : index
    %c0_21 = arith.constant 0 : index
    %39 = vector.load %arg7[%c0_20, %c0_21] : memref<1x256xf32, #tpu.memory_space<vmem>>, vector<1x256xf32>
    %40 = vector.broadcast %39 : vector<1x256xf32> to vector<8x256xf32>
    %41 = arith.addf %38, %40 : vector<8x256xf32>
    %c0_22 = arith.constant 0 : index
    %c0_23 = arith.constant 0 : index
    %42 = vector.load %arg8[%c0_22, %c0_23] : memref<8x256xf32, #tpu.memory_space<vmem>>, vector<8x256xf32>
    tpu.vector_store %arg8[%c0_22, %c0_23], %41 {strides = array<i32>} : memref<8x256xf32, #tpu.memory_space<vmem>>, vector<8x256xf32>,
    return
  }
  func.func @transform_0(%arg0: i32) -> (i32, i32) {
    %c0_i32 = arith.constant 0 : i32
    %c0_i32_0 = arith.constant 0 : i32
    return %arg0, %c0_i32 : i32, i32
  }
  func.func @transform_1(%arg0: i32) -> (i32, i32) {
    %c0_i32 = arith.constant 0 : i32
    %c0_i32_0 = arith.constant 0 : i32
    %c0_i32_1 = arith.constant 0 : i32
    return %c0_i32, %c0_i32_0 : i32, i32
  }
  func.func @transform_2(%arg0: i32) -> (i32, i32) {
    %c0_i32 = arith.constant 0 : i32
    %c0_i32_0 = arith.constant 0 : i32
    %c0_i32_1 = arith.constant 0 : i32
    return %c0_i32, %c0_i32_0 : i32, i32
  }
  func.func @transform_3(%arg0: i32) -> (i32, i32) {
    %c0_i32 = arith.constant 0 : i32
    %c0_i32_0 = arith.constant 0 : i32
    %c0_i32_1 = arith.constant 0 : i32
    return %c0_i32, %c0_i32_0 : i32, i32
  }
  func.func @transform_4(%arg0: i32) -> (i32, i32) {
    %c0_i32 = arith.constant 0 : i32
    %c0_i32_0 = arith.constant 0 : i32
    %c0_i32_1 = arith.constant 0 : i32
    return %c0_i32, %c0_i32_0 : i32, i32
  }
  func.func @transform_5(%arg0: i32) -> (i32, i32) {
    %c0_i32 = arith.constant 0 : i32
    %c0_i32_0 = arith.constant 0 : i32
    %c0_i32_1 = arith.constant 0 : i32
    return %c0_i32, %c0_i32_0 : i32, i32
  }
  func.func @transform_6(%arg0: i32) -> (i32, i32) {
    %c0_i32 = arith.constant 0 : i32
    %c0_i32_0 = arith.constant 0 : i32
    %c0_i32_1 = arith.constant 0 : i32
    return %c0_i32, %c0_i32_0 : i32, i32
  }
  func.func @transform_7(%arg0: i32) -> (i32, i32) {
    %c0_i32 = arith.constant 0 : i32
    %c0_i32_0 = arith.constant 0 : i32
    return %arg0, %c0_i32 : i32, i32
  }
}

module attributes {stable_mosaic.version = 11 : i64} {
  func.func @ffn_kernel(%arg0: i32, %arg1: memref<8x256xf32, #tpu.memory_space<vmem>>, %arg2: memref<256x512xf32, #tpu.memory_space<vmem>>, %arg3: memref<1x512xf32, #tpu.memory_space<vmem>>, %arg4: memref<512x256xf32, #tpu.memory_space<vmem>>, %arg5: memref<1x256xf32, #tpu.memory_space<vmem>>, %arg6: memref<1x256xf32, #tpu.memory_space<vmem>>, %arg7: memref<1x256xf32, #tpu.memory_space<vmem>>, %arg8: memref<8x256xf32, #tpu.memory_space<vmem>>) attributes {dimension_semantics = [#tpu.dimension_semantics<parallel>], iteration_bounds = array<i64: 2>, scalar_prefetch = 0 : i64, scratch_operands = 0 : i64, tpu.core_type = #tpu.core_type<tc>, window_params = [{transform_indices = @transform_0, window_bounds = array<i64: 8, 256>}, {pipeline_mode = #tpu.pipeline_mode<synchronous>, transform_indices = @transform_1, window_bounds = array<i64: 256, 512>}, {pipeline_mode = #tpu.pipeline_mode<synchronous>, transform_indices = @transform_2, window_bounds = array<i64: 1, 512>}, {pipeline_mode = #tpu.pipeline_mode<synchronous>, transform_indices = @transform_3, window_bounds = array<i64: 512, 256>}, {pipeline_mode = #tpu.pipeline_mode<synchronous>, transform_indices = @transform_4, window_bounds = array<i64: 1, 256>}, {pipeline_mode = #tpu.pipeline_mode<synchronous>, transform_indices = @transform_5, window_bounds = array<i64: 1, 256>}, {pipeline_mode = #tpu.pipeline_mode<synchronous>, transform_indices = @transform_6, window_bounds = array<i64: 1, 256>}, {transform_indices = @transform_7, window_bounds = array<i64: 8, 256>}]} {
    %c0 = arith.constant 0 : index
    %c0_0 = arith.constant 0 : index
    %0 = vector.load %arg1[%c0, %c0_0] : memref<8x256xf32, #tpu.memory_space<vmem>>, vector<8x256xf32>
    %cst = arith.constant 0.000000e+00 : f32
    %1 = vector.broadcast %cst : f32 to vector<8x256xf32>
    %c0_1 = arith.constant 0 : index
    %c0_2 = arith.constant 0 : index
    %2 = vector.load %arg2[%c0_1, %c0_2] : memref<256x512xf32, #tpu.memory_space<vmem>>, vector<256x512xf32>
    %cst_3 = arith.constant dense<0.000000e+00> : vector<8x512xf32>
    %3 = tpu.matmul %0, %2, %cst_3 {dimension_numbers = #tpu.dot_dimension_numbers<[1], [0], [0], [1], [0, 0, 1, 1], [], []>} : vector<8x256xf32>, vector<256x512xf32>, vector<8x512xf32> -> vector<8x512xf32>
    %c0_4 = arith.constant 0 : index
    %c0_5 = arith.constant 0 : index
    %4 = vector.load %arg3[%c0_4, %c0_5] : memref<1x512xf32, #tpu.memory_space<vmem>>, vector<1x512xf32>
    %5 = vector.broadcast %4 : vector<1x512xf32> to vector<8x512xf32>
    %6 = arith.addf %3, %5 : vector<8x512xf32>
    %cst_6 = arith.constant 0.000000e+00 : f32
    %7 = vector.broadcast %cst_6 : f32 to vector<8x512xf32>
    %8 = arith.maximumf %6, %7 : vector<8x512xf32>
    %c0_7 = arith.constant 0 : index
    %c0_8 = arith.constant 0 : index
    %9 = vector.load %arg4[%c0_7, %c0_8] : memref<512x256xf32, #tpu.memory_space<vmem>>, vector<512x256xf32>
    %cst_9 = arith.constant dense<0.000000e+00> : vector<8x256xf32>
    %10 = tpu.matmul %8, %9, %cst_9 {dimension_numbers = #tpu.dot_dimension_numbers<[1], [0], [0], [1], [0, 0, 1, 1], [], []>} : vector<8x512xf32>, vector<512x256xf32>, vector<8x256xf32> -> vector<8x256xf32>
    %11 = arith.addf %1, %10 : vector<8x256xf32>
    %c0_10 = arith.constant 0 : index
    %c0_11 = arith.constant 0 : index
    %12 = vector.load %arg5[%c0_10, %c0_11] : memref<1x256xf32, #tpu.memory_space<vmem>>, vector<1x256xf32>
    %13 = vector.broadcast %12 : vector<1x256xf32> to vector<8x256xf32>
    %14 = arith.addf %11, %13 : vector<8x256xf32>
    %15 = arith.addf %14, %0 : vector<8x256xf32>
    %cst_12 = arith.constant dense<0.000000e+00> : vector<8xf32>
    %16 = vector.multi_reduction <add>, %15, %cst_12 [1] : vector<8x256xf32> to vector<8xf32>
    %17 = vector.shape_cast %16 : vector<8xf32> to vector<8x1xf32>
    %cst_13 = arith.constant 3.906250e-03 : f32
    %18 = vector.broadcast %cst_13 : f32 to vector<8x1xf32>
    %19 = arith.mulf %17, %18 : vector<8x1xf32>
    %20 = arith.mulf %15, %15 : vector<8x256xf32>
    %cst_14 = arith.constant dense<0.000000e+00> : vector<8xf32>
    %21 = vector.multi_reduction <add>, %20, %cst_14 [1] : vector<8x256xf32> to vector<8xf32>
    %22 = vector.shape_cast %21 : vector<8xf32> to vector<8x1xf32>
    %cst_15 = arith.constant 3.906250e-03 : f32
    %23 = vector.broadcast %cst_15 : f32 to vector<8x1xf32>
    %24 = arith.mulf %22, %23 : vector<8x1xf32>
    %25 = arith.mulf %19, %19 : vector<8x1xf32>
    %26 = arith.subf %24, %25 : vector<8x1xf32>
    %cst_16 = arith.constant 0.000000e+00 : f32
    %27 = vector.broadcast %cst_16 : f32 to vector<8x1xf32>
    %28 = arith.maximumf %26, %27 : vector<8x1xf32>
    %29 = vector.broadcast %19 : vector<8x1xf32> to vector<8x256xf32>
    %30 = arith.subf %15, %29 : vector<8x256xf32>
    %cst_17 = arith.constant 9.99999974E-6 : f32
    %31 = vector.broadcast %cst_17 : f32 to vector<8x1xf32>
    %32 = arith.addf %28, %31 : vector<8x1xf32>
    %33 = math.rsqrt %32 : vector<8x1xf32>
    %34 = vector.broadcast %33 : vector<8x1xf32> to vector<8x256xf32>
    %35 = arith.mulf %30, %34 : vector<8x256xf32>
    %c0_18 = arith.constant 0 : index
    %c0_19 = arith.constant 0 : index
    %36 = vector.load %arg6[%c0_18, %c0_19] : memref<1x256xf32, #tpu.memory_space<vmem>>, vector<1x256xf32>
    %37 = vector.broadcast %36 : vector<1x256xf32> to vector<8x256xf32>
    %38 = arith.mulf %35, %37 : vector<8x256xf32>
    %c0_20 = arith.constant 0 : index
    %c0_21 = arith.constant 0 : index
    %39 = vector.load %arg7[%c0_20, %c0_21] : memref<1x256xf32, #tpu.memory_space<vmem>>, vector<1x256xf32>
    %40 = vector.broadcast %39 : vector<1x256xf32> to vector<8x256xf32>
    %41 = arith.addf %38, %40 : vector<8x256xf32>
    %c0_22 = arith.constant 0 : index
    %c0_23 = arith.constant 0 : index
    %42 = vector.load %arg8[%c0_22, %c0_23] : memref<8x256xf32, #tpu.memory_space<vmem>>, vector<8x256xf32>
    tpu.vector_store %arg8[%c0_22, %c0_23], %41 {strides = array<i32>} : memref<8x256xf32, #tpu.memory_space<vmem>>, vector<8x256xf32>,
    return
  }
  func.func @transform_0(%arg0: i32) -> (i32, i32) {
    %c0_i32 = arith.constant 0 : i32
    %c0_i32_0 = arith.constant 0 : i32
    return %arg0, %c0_i32 : i32, i32
  }
  func.func @transform_1(%arg0: i32) -> (i32, i32) {
    %c0_i32 = arith.constant 0 : i32
    %c0_i32_0 = arith.constant 0 : i32
    %c0_i32_1 = arith.constant 0 : i32
    return %c0_i32, %c0_i32_0 : i32, i32
  }
  func.func @transform_2(%arg0: i32) -> (i32, i32) {
    %c0_i32 = arith.constant 0 : i32
    %c0_i32_0 = arith.constant 0 : i32
    %c0_i32_1 = arith.constant 0 : i32
    return %c0_i32, %c0_i32_0 : i32, i32
  }
  func.func @transform_3(%arg0: i32) -> (i32, i32) {
    %c0_i32 = arith.constant 0 : i32
    %c0_i32_0 = arith.constant 0 : i32
    %c0_i32_1 = arith.constant 0 : i32
    return %c0_i32, %c0_i32_0 : i32, i32
  }
  func.func @transform_4(%arg0: i32) -> (i32, i32) {
    %c0_i32 = arith.constant 0 : i32
    %c0_i32_0 = arith.constant 0 : i32
    %c0_i32_1 = arith.constant 0 : i32
    return %c0_i32, %c0_i32_0 : i32, i32
  }
  func.func @transform_5(%arg0: i32) -> (i32, i32) {
    %c0_i32 = arith.constant 0 : i32
    %c0_i32_0 = arith.constant 0 : i32
    %c0_i32_1 = arith.constant 0 : i32
    return %c0_i32, %c0_i32_0 : i32, i32
  }
  func.func @transform_6(%arg0: i32) -> (i32, i32) {
    %c0_i32 = arith.constant 0 : i32
    %c0_i32_0 = arith.constant 0 : i32
    %c0_i32_1 = arith.constant 0 : i32
    return %c0_i32, %c0_i32_0 : i32, i32
  }
  func.func @transform_7(%arg0: i32) -> (i32, i32) {
    %c0_i32 = arith.constant 0 : i32
    %c0_i32_0 = arith.constant 0 : i32
    return %arg0, %c0_i32 : i32, i32
  }
}

</mosaic_0001>

<bundles_post_ra>
// kernel: tpu_custom_call.1
= control target key start
LH: loop header
LB: loop body
LE: loop exit
PB: predicated region body
PF: predicated region fallthrough
CT: control target
= control target key end

     0   :  { %s1638_s0 = inlined_call_operand.hbm [shape: f32[16,256], index: 0, kind: input, shape index: {}]   ;;  %s1639_s1 = inlined_call_operand.hbm [shape: f32[256,512], index: 1, kind: input, shape index: {}]   ;;  %s1640_s2 = inlined_call_operand.hbm [shape: f32[1,512], index: 2, kind: input, shape index: {}]   ;;  %s1641_s3 = inlined_call_operand.hbm [shape: f32[512,256], index: 3, kind: input, shape index: {}]   ;;  %s1642_s4 = inlined_call_operand.vmem [shape: f32[1,256], index: 4, kind: input, shape index: {}]   ;;  %s1643_s5 = inlined_call_operand.vmem [shape: f32[1,256], index: 5, kind: input, shape index: {}]   ;;  %s1644_s6 = inlined_call_operand.vmem [shape: f32[1,256], index: 6, kind: input, shape index: {}]   ;;  %s1645_s7 = inlined_call_operand.hbm [shape: f32[16,256], index: 7, kind: output, shape index: {}]  }
   0x1   :  { %1650 = sst [smem:[#allocation15_spill]] %s1639_s1 }
   0x2   :  { %1651 = sst [smem:[#allocation16_spill]] %s1640_s2 }
   0x3   :  { %12 = vsyncpa [#allocation3], 0 }
   0x4   :  { %14 = vsyncpa [#allocation3 + $0x1], 0 }
   0x5   :  { %15 = vsyncpa [#allocation6], 0 }
   0x6   :  { %16 = vsyncpa [#allocation9], 0 }
   0x7   :  { %17 = vsyncpa [#allocation4], 0 }
   0x8   :  { %19 = vsyncpa [#allocation4 + $0x1], 0  ;;  %s1416_s24 = smov 0   ;;  %s1418_s25 = smov 0  }
   0x9   :  { %s1420_s26 = smov 0   ;;  %s1422_s27 = smov 0  }
   0xa LB: > { %s1437_s28 = sadd.s32 4294967295, %s1365_s27   ;;  %s1082_s29 = sadd.s32 4294967294, %s1365_s27   ;;  %s1365_s27 = sphi %s1422_s27, %s1673_s27   ;;  %s1361_s26 = sphi %s1420_s26, %s1672_s26   ;;  %s1357_s25 = sphi %s1418_s25, %s1671_s25   ;;  %s1353_s24 = sphi %s1416_s24, %s1670_s24  }
   0xb   : > { %p45_p0 = scmp.ne.s32.totalorder %s1357_s25, %s1353_s24  ;;  %p1646_p1 = scmp.eq.s32.totalorder %s1437_s28, 0 }
   0xc   : > { %p201_p3 = scmp.eq.s32.totalorder %s1082_s29, 1  ;;  %p1083_p5 = scmp.ge.s32.totalorder %s1365_s27, 1 }
   0xd   : > { %p1446_p4 = por %p1646_p1, %p45_p0  ;;  %p208_p7 = scmp.lt.s32.totalorder %s1365_s27, 3 }
   0xe   : > { %p1451_p6 = por %p201_p3, %p45_p0  ;;  %s1367_s10 = smov [#allocation5]  }
   0xf   : > { %s1652_s30 = scalar_select %p1446_p4, 1, 0 }
  0x10   : > { %s1653_s8 = scalar_select %p1451_p6, 1, 0 }
  0x11   : > { %p1456_p8 = pnand %p1083_p5, %p208_p7  ;;  %s220_s11 = sshll.u32 %s1367_s10, 4  ;;  %s221_s11 = int_to_ptr.vmem [resolvable:$true] %s220_s11 }
  0x12   : > { %s1368_s13 = smov [#allocation7]   ;;  %s1369_s15 = smov [#allocation8]  }
  0x13   : > { %s1654_s9 = scalar_select %p1456_p8, 1, 0 }
  0x14   : > { %p1120_p9 = pneg %p1456_p8  ;;  %s234_s14 = sshll.u32 %s1368_s13, 4  ;;  %s235_s14 = int_to_ptr.vmem [resolvable:$true] %s234_s14 }
  0x15   : > { %s244_s16 = sshll.u32 %s1369_s15, 4  ;;  %s1198_s17 = scalar_lea.vmem %s221_s11, 16384  ;;  %s245_s16 = int_to_ptr.vmem [resolvable:$true] %s244_s16 }
  0x16   : > { %p1465_p11 = pnand %p1120_p9, %p1646_p1  ;;  %p1199_p13 = scmp.ne.s32.totalorder %s221_s11, %s1198_s17 }
  0x17   : > { %p1206_p5 = scmp.lt.s32.totalorder %s221_s11, %s221_s11  ;;  %p1207_p7 = scmp.lt.s32.totalorder %s1198_s17, %s1198_s17 }
  0x18   : > { %p1189_p12 = pneg %p1465_p11 }
  0x19   : > { %p1208_p9 = por %p1207_p7, %p1206_p5 }
  0x1a   : > { %p1201_p0 = pnand %p1199_p13, %p1189_p12 }
  0x1c   : > { %p1202_p3 = pneg %p1201_p0 }
  0x1e   : > { %p1209_p10 = pnand %p1208_p9, %p1202_p3 }
  0x20   : > { %1212 = shalt.err (!%p1209_p10)
}
  0x21   : > { %s1370_s18 = smov 512   ;;  %s1371_s19 = smov 32  }
  0x22   : > { %s1656_s1 = sld [smem:[#allocation15_spill]]  ;;  %s1224_s22 = scalar_lea.vmem %s235_s14, 64 }
  0x23   : > { %p1225_p1 = scmp.ne.s32.totalorder %s235_s14, %s1224_s22  ;;  %p1232_p2 = scmp.lt.s32.totalorder %s235_s14, %s235_s14 }
  0x24   : > { %p1233_p6 = scmp.lt.s32.totalorder %s1224_s22, %s1224_s22 }
  0x25   : > { %p1227_p13 = pnand %p1225_p1, %p1189_p12 }
  0x26   : > { %p1234_p5 = por %p1233_p6, %p1232_p2 }
  0x27   : > { %p1228_p0 = pneg %p1227_p13 }
  0x28   : > { %1123 = dma.hbm_to_vmem [thread:$0]  (!%p1465_p11), %s1656_s1, 16384, %s221_s11, [#allocation6], %s1370_s18, %s1370_s18, %s1371_s19  }
  0x29   : > { %p1235_p3 = pnand %p1234_p5, %p1228_p0 }
  0x2b   : > { %1238 = shalt.err (!%p1235_p3)
}
  0x2c   : > { %s1657_s2 = sld [smem:[#allocation16_spill]]  ;;  %s1250_s10 = scalar_lea.vmem %s245_s16, 16384 }
  0x2d   : > { %p1251_p10 = scmp.ne.s32.totalorder %s245_s16, %s1250_s10  ;;  %p1258_p9 = scmp.lt.s32.totalorder %s245_s16, %s245_s16 }
  0x2e   : > { %p1259_p13 = scmp.lt.s32.totalorder %s1250_s10, %s1250_s10 }
  0x2f   : > { %p1253_p7 = pnand %p1251_p10, %p1189_p12 }
  0x30   : > { %p1260_p4 = por %p1259_p13, %p1258_p9 }
  0x31   : > { %p1254_p1 = pneg %p1253_p7 }
  0x32   : > { %1126 = dma.hbm_to_vmem [thread:$0]  (!%p1465_p11), %s1657_s2, 64, %s235_s14, [#allocation6]  }
  0x33   : > { %p1261_p2 = pnand %p1260_p4, %p1254_p1 }
  0x35   : > { %1264 = shalt.err (!%p1261_p2)
}
  0x36   : > { %s1372_s11 = smov 256   ;;  %s1373_s13 = smov 16  }
  0x37   : > { %1129 = dma.hbm_to_vmem [thread:$0]  (!%p1465_p11), %s1641_s3, 16384, %s245_s16, [#allocation9], %s1372_s11, %s1372_s11, %s1373_s13  }
  0x38   : > { %s1496_s17 = sadd.s32 1, %s1365_s27   ;;  %s32_s19 = sadd.s32 1, %s1361_s26 }
  0x39   : > { %s29_s18 = ssub.s32 %s1365_s27, %s1496_s17  ;;  %p39_p6 = scmp.ne.s32.totalorder %s1361_s26, %s1357_s25 }
  0x3a   : > { %p30_p4 = scmp.eq.s32.totalorder %s29_s18, 0  ;;  %p40_p12 = scmp.eq.s32.totalorder %s1365_s27, 0 }
  0x3b   : > { %p1141_p0 = scmp.lt.s32.totalorder %s1365_s27, 2  ;;  %p1658_p3 = scmp.eq.s32.totalorder %s1437_s28, 1 }
  0x3c   : > { %s1506_s20 = scalar_select %p30_p4, %s1361_s26, %s32_s19  }
  0x3d   : > { %p41_p5 = por %p40_p12, %p39_p6  ;;  %p1510_p10 = por %p1658_p3, %p39_p6 }
  0x3e   : > { %s267_s12 = sand.u32 1, %s1361_s26   ;;  %s1102_s22 = sshll.u32 %s1365_s27, 8 }
  0x3f   : > { %s1659_s21 = scalar_select %p1510_p10, 1, 0 }
  0x40   : > { %s1088_s16 = sshll.u32 %s267_s12, 4  ;;  %s1519_s10 = scalar_lea.hbm %s1638_s0, %s1102_s22 }
  0x41   : > { %s271_s11 = scalar_lea.vmem [#allocation2], %s1088_s16  ;;  %p1521_p11 = pnand %p1141_p0, %p41_p5 }
  0x42   : > { %s279_s13 = sshll.u32 %s271_s11, 4  ;;  %s268_s15 = scalar_lea.sflag [#allocation3], %s267_s12  ;;  %s280_s13 = int_to_ptr.vmem [resolvable:$true] %s279_s13 }
  0x43   : > { %s1265_s18 = scalar_lea.hbm %s1519_s10, 256  ;;  %p1267_p1 = pneg %p1521_p11 }
  0x44   : > { %p1266_p7 = scmp.ne.s32.totalorder %s1519_s10, %s1265_s18  ;;  %s1270_s23 = scalar_lea.hbm %s1638_s0, 512 }
  0x45   : > { %p1271_p2 = scmp.lt.s32.totalorder %s1519_s10, %s1638_s0  ;;  %p1272_p4 = scmp.lt.s32.totalorder %s1270_s23, %s1265_s18 }
  0x46   : > { %p1268_p9 = pnand %p1267_p1, %p1266_p7 }
  0x47   : > { %p1273_p6 = por %p1272_p4, %p1271_p2 }
  0x48   : > { %p1269_p13 = pneg %p1268_p9 }
  0x4a   : > { %p1274_p12 = pnand %p1273_p6, %p1269_p13 }
  0x4c   : > { %1277 = shalt.err (!%p1274_p12)
}
  0x4d   : > { %s1278_s11 = scalar_lea.vmem %s280_s13, 256  ;;  %s1374_s12 = smov [#allocation2]  }
  0x4e   : > { %p1279_p0 = scmp.ne.s32.totalorder %s280_s13, %s1278_s11  ;;  %s1283_s1 = sshll.u32 %s1374_s12, 4  ;;  %s1284_s1 = int_to_ptr.vmem [resolvable:$false] %s1283_s1 }
  0x4f   : > { %s1285_s2 = scalar_lea.vmem %s1284_s1, 512  ;;  %p1286_p7 = scmp.lt.s32.totalorder %s280_s13, %s1284_s1 }
  0x50   : > { %p1281_p5 = pnand %p1279_p0, %p1267_p1  ;;  %p1287_p9 = scmp.lt.s32.totalorder %s1285_s2, %s1278_s11 }
  0x52   : > { %p1282_p3 = pneg %p1281_p5  ;;  %p1288_p10 = por %p1287_p9, %p1286_p7 }
  0x54   : > { %p1289_p8 = pnand %p1288_p10, %p1282_p3 }
  0x56   : > { %1292 = shalt.err (!%p1289_p8)
}
  0x57   : > { %1133 = dma.hbm_to_vmem [thread:$0]  (!%p1521_p11), %s1519_s10, 256, %s280_s13, %s268_s15  }
  0x58   : > { %p1661_p13 = scmp.ne.s32.totalorder %s1654_s9, 0 }
  0x59   : > { %s1542_s18 = sand.u32 (!%p1661_p13), 1, %s1357_s25   ;;  %p1662_p8 = scmp.ne.s32.totalorder (!%p1661_p13), %s1652_s30, 0 }
  0x5a   : > { %288 = sbr.rel (%p1661_p13) target bundleno = 754 (0x2f2), region = 48  ;;  %s1092_s19 = sshll.u32 (!%p1661_p13), %s1542_s18, 4 }
  0x5b   : > { %s291_s1 = scalar_lea.sflag (!%p1661_p13), [#allocation3], %s1542_s18  ;;  %s1548_s2 = scalar_lea.vmem (!%p1661_p13), [#allocation2], %s1092_s19 }
  0x5f   : > { %1336 = dma.done.wait (%p1662_p8), %s291_s1, 256  }
  0x60   : > { %1338 = vsyncadd (%p1662_p8), %s291_s1, 4294967040  ;;  %p1663_p10 = scmp.eq.s32.totalorder %s1437_s28, 0 }
  0x62   : > { %1340 = dma.done.wait (%p1663_p10), [#allocation6], 16448   ;;  %p1664_p11 = pmov %p1663_p10 }
  0x63   : > { %p1665_p1 = pmov %p1663_p10 }
  0x64   : > { %1342 = vsyncadd (%p1664_p11), [#allocation6], 4294950848 }
  0x65   : > { %1344 = dma.done.wait (%p1665_p1), [#allocation9], 16384   ;;  %p1666_p2 = pmov %p1665_p1 }
  0x66   : > { %v400_v0 = vld [vmem:[#allocation5 + $0x1e8] sm:$0xff]  ;;  %v402_v1 = vld [vmem:[#allocation5 + $0x1f8] sm:$0xff]  ;;  %v399_v2 = vld [vmem:[#allocation5 + $0x1e0] sm:$0xff]  ;;  %s1103_s22 = sshll.u32 %s1437_s28, 8  ;;  %s336_s23 = scalar_lea.vmem [#allocation10], %s1092_s19 }
  0x67   : > { %1346 = vsyncadd (%p1666_p2), [#allocation9], 4294950912  ;;  %489 = vmatprep.subr.mxu0 %v400_v0  ;;  %560 = vmatprep.subr.mxu1 %v402_v1  ;;  %v401_v3 = vld [vmem:[#allocation5 + $0x1f0] sm:$0xff]  ;;  %v396_v4 = vld [vmem:[#allocation5 + $0x1c8] sm:$0xff]  ;;  %s983_s29 = sshll.u32 %s336_s23, 4  ;;  %s1601_s12 = scalar_lea.hbm %s1645_s7, %s1103_s22  ;;  %s984_s29 = int_to_ptr.vmem [resolvable:$true] %s983_s29 }
  0x68   : > { %v398_v5 = vld [vmem:[#allocation5 + $0x1d8] sm:$0xff]  ;;  %490 = vmatpush1.msra.mxu0 %v399_v2  ;;  %561 = vmatpush1.msra.mxu1 %v401_v3  ;;  %v395_v6 = vld [vmem:[#allocation5 + $0x1c0] sm:$0xff]  ;;  %v397_v7 = vld [vmem:[#allocation5 + $0x1d0] sm:$0xff]  ;;  %s969_s1 = scalar_lea.sflag [#allocation4], %s1542_s18  ;;  %p1667_p6 = scmp.ne.s32.totalorder %s1659_s21, 0 }
  0x69   : > { %v392_v8 = vld [vmem:[#allocation5 + $0x1a8] sm:$0xff]  ;;  %491 = vmatprep.subr.mxu0 %v396_v4  ;;  %562 = vmatprep.subr.mxu1 %v398_v5  ;;  %v394_v9 = vld [vmem:[#allocation5 + $0x1b8] sm:$0xff]  ;;  %v391_v10 = vld [vmem:[#allocation5 + $0x1a0] sm:$0xff]  ;;  %s1375_s28 = smov [#allocation10]  }
  0x6a   : > { %v393_v11 = vld [vmem:[#allocation5 + $0x1b0] sm:$0xff]  ;;  %492 = vmatpush1.msra.mxu0 %v395_v6  ;;  %563 = vmatpush1.msra.mxu1 %v397_v7  ;;  %v388_v12 = vld [vmem:[#allocation5 + $0x188] sm:$0xff]  ;;  %v390_v13 = vld [vmem:[#allocation5 + $0x198] sm:$0xff]  ;;  %s1297_s19 = sshll.u32 %s1375_s28, 4  ;;  %s1298_s19 = int_to_ptr.vmem [resolvable:$false] %s1297_s19 }
  0x6b   : > { %493 = vmatprep.subr.mxu0 %v392_v8  ;;  %564 = vmatprep.subr.mxu1 %v394_v9  ;;  %v387_v14 = vld [vmem:[#allocation5 + $0x180] sm:$0xff]  ;;  %v389_v15 = vld [vmem:[#allocation5 + $0x190] sm:$0xff]  ;;  %v384_v16 = vld [vmem:[#allocation5 + $0x168] sm:$0xff]  ;;  %s1299_s30 = scalar_lea.vmem %s1298_s19, 512  ;;  %p1300_p5 = scmp.lt.s32.totalorder %s984_s29, %s1298_s19 }
  0x6c   : > { %494 = vmatpush1.msra.mxu0 %v391_v10  ;;  %565 = vmatpush1.msra.mxu1 %v393_v11  ;;  %v386_v17 = vld [vmem:[#allocation5 + $0x178] sm:$0xff]  ;;  %v383_v18 = vld [vmem:[#allocation5 + $0x160] sm:$0xff]  ;;  %v385_v19 = vld [vmem:[#allocation5 + $0x170] sm:$0xff] }
  0x6d   : > { %495 = vmatprep.subr.mxu0 %v388_v12  ;;  %566 = vmatprep.subr.mxu1 %v390_v13  ;;  %v380_v20 = vld [vmem:[#allocation5 + $0x148] sm:$0xff]  ;;  %v382_v21 = vld [vmem:[#allocation5 + $0x158] sm:$0xff]  ;;  %v379_v22 = vld [vmem:[#allocation5 + $0x140] sm:$0xff] }
  0x6e   : > { %496 = vmatpush1.msra.mxu0 %v387_v14  ;;  %567 = vmatpush1.msra.mxu1 %v389_v15  ;;  %v381_v23 = vld [vmem:[#allocation5 + $0x150] sm:$0xff]  ;;  %v376_v24 = vld [vmem:[#allocation5 + $0x128] sm:$0xff]  ;;  %v378_v25 = vld [vmem:[#allocation5 + $0x138] sm:$0xff] }
  0x6f   : > { %497 = vmatprep.subr.mxu0 %v384_v16  ;;  %568 = vmatprep.subr.mxu1 %v386_v17  ;;  %v375_v26 = vld [vmem:[#allocation5 + $0x120] sm:$0xff]  ;;  %v377_v27 = vld [vmem:[#allocation5 + $0x130] sm:$0xff]  ;;  %v372_v28 = vld [vmem:[#allocation5 + $0x108] sm:$0xff] }
  0x70   : > { %498 = vmatpush1.msra.mxu0 %v383_v18  ;;  %569 = vmatpush1.msra.mxu1 %v385_v19  ;;  %v374_v29 = vld [vmem:[#allocation5 + $0x118] sm:$0xff]  ;;  %v371_v30 = vld [vmem:[#allocation5 + $0x100] sm:$0xff]  ;;  %v373_v31 = vld [vmem:[#allocation5 + $0x110] sm:$0xff] }
  0x71   : > { %499 = vmatprep.subr.mxu0 %v380_v20  ;;  %570 = vmatprep.subr.mxu1 %v382_v21  ;;  %v368_v32 = vld [vmem:[#allocation5 + $0xe8] sm:$0xff]  ;;  %v370_v33 = vld [vmem:[#allocation5 + $0xf8] sm:$0xff]  ;;  %v367_v34 = vld [vmem:[#allocation5 + $0xe0] sm:$0xff] }
  0x72   : > { %500 = vmatpush1.msra.mxu0 %v379_v22  ;;  %571 = vmatpush1.msra.mxu1 %v381_v23  ;;  %v369_v35 = vld [vmem:[#allocation5 + $0xf0] sm:$0xff]  ;;  %v364_v36 = vld [vmem:[#allocation5 + $0xc8] sm:$0xff]  ;;  %v366_v37 = vld [vmem:[#allocation5 + $0xd8] sm:$0xff] }
  0x73   : > { %501 = vmatprep.subr.mxu0 %v376_v24  ;;  %572 = vmatprep.subr.mxu1 %v378_v25  ;;  %v363_v38 = vld [vmem:[#allocation5 + $0xc0] sm:$0xff]  ;;  %v365_v39 = vld [vmem:[#allocation5 + $0xd0] sm:$0xff]  ;;  %v360_v40 = vld [vmem:[#allocation5 + $0xa8] sm:$0xff] }
  0x74   : > { %502 = vmatpush1.msra.mxu0 %v375_v26  ;;  %573 = vmatpush1.msra.mxu1 %v377_v27  ;;  %v362_v41 = vld [vmem:[#allocation5 + $0xb8] sm:$0xff]  ;;  %v359_v42 = vld [vmem:[#allocation5 + $0xa0] sm:$0xff]  ;;  %v361_v43 = vld [vmem:[#allocation5 + $0xb0] sm:$0xff] }
  0x75   : > { %503 = vmatprep.subr.mxu0 %v372_v28  ;;  %574 = vmatprep.subr.mxu1 %v374_v29  ;;  %v356_v44 = vld [vmem:[#allocation5 + $0x88] sm:$0xff]  ;;  %v358_v45 = vld [vmem:[#allocation5 + $0x98] sm:$0xff]  ;;  %v355_v46 = vld [vmem:[#allocation5 + $0x80] sm:$0xff] }
  0x76   : > { %504 = vmatpush1.msra.mxu0 %v371_v30  ;;  %575 = vmatpush1.msra.mxu1 %v373_v31  ;;  %v357_v47 = vld [vmem:[#allocation5 + $0x90] sm:$0xff]  ;;  %v352_v48 = vld [vmem:[#allocation5 + $0x68] sm:$0xff]  ;;  %v354_v49 = vld [vmem:[#allocation5 + $0x78] sm:$0xff] }
  0x77   : > { %505 = vmatprep.subr.mxu0 %v368_v32  ;;  %576 = vmatprep.subr.mxu1 %v370_v33  ;;  %v351_v50 = vld [vmem:[#allocation5 + $0x60] sm:$0xff]  ;;  %v353_v51 = vld [vmem:[#allocation5 + $0x70] sm:$0xff]  ;;  %v348_v52 = vld [vmem:[#allocation5 + $0x48] sm:$0xff] }
  0x78   : > { %506 = vmatpush1.msra.mxu0 %v367_v34  ;;  %577 = vmatpush1.msra.mxu1 %v369_v35  ;;  %v350_v53 = vld [vmem:[#allocation5 + $0x58] sm:$0xff]  ;;  %v347_v54 = vld [vmem:[#allocation5 + $0x40] sm:$0xff]  ;;  %v349_v55 = vld [vmem:[#allocation5 + $0x50] sm:$0xff] }
  0x79   : > { %507 = vmatprep.subr.mxu0 %v364_v36  ;;  %578 = vmatprep.subr.mxu1 %v366_v37  ;;  %v344_v56 = vld [vmem:[#allocation5 + $0x28] sm:$0xff]  ;;  %v346_v57 = vld [vmem:[#allocation5 + $0x38] sm:$0xff]  ;;  %v343_v58 = vld [vmem:[#allocation5 + $0x20] sm:$0xff] }
  0x7a   : > { %508 = vmatpush1.msra.mxu0 %v363_v38  ;;  %579 = vmatpush1.msra.mxu1 %v365_v39  ;;  %v345_v59 = vld [vmem:[#allocation5 + $0x30] sm:$0xff]  ;;  %v340_v60 = vld [vmem:[#allocation5 + $0x8] sm:$0xff]  ;;  %v342_v61 = vld [vmem:[#allocation5 + $0x18] sm:$0xff] }
  0x7b   : > { %509 = vmatprep.subr.mxu0 %v360_v40  ;;  %580 = vmatprep.subr.mxu1 %v362_v41  ;;  %v339_v62 = vld [vmem:[#allocation5] sm:$0xff]  ;;  %v341_v63 = vld [vmem:[#allocation5 + $0x10] sm:$0xff]  ;;  %v464_v0 = vld [vmem:[#allocation5 + $0x3e8] sm:$0xff] }
  0x7c   : > { %510 = vmatpush1.msra.mxu0 %v359_v42  ;;  %581 = vmatpush1.msra.mxu1 %v361_v43  ;;  %v466_v1 = vld [vmem:[#allocation5 + $0x3f8] sm:$0xff]  ;;  %v463_v2 = vld [vmem:[#allocation5 + $0x3e0] sm:$0xff]  ;;  %v465_v3 = vld [vmem:[#allocation5 + $0x3f0] sm:$0xff] }
  0x7d   : > { %511 = vmatprep.subr.mxu0 %v356_v44  ;;  %582 = vmatprep.subr.mxu1 %v358_v45  ;;  %v460_v4 = vld [vmem:[#allocation5 + $0x3c8] sm:$0xff]  ;;  %v462_v5 = vld [vmem:[#allocation5 + $0x3d8] sm:$0xff]  ;;  %v459_v6 = vld [vmem:[#allocation5 + $0x3c0] sm:$0xff] }
  0x7e   : > { %512 = vmatpush1.msra.mxu0 %v355_v46  ;;  %583 = vmatpush1.msra.mxu1 %v357_v47  ;;  %v461_v7 = vld [vmem:[#allocation5 + $0x3d0] sm:$0xff]  ;;  %v456_v8 = vld [vmem:[#allocation5 + $0x3a8] sm:$0xff]  ;;  %v458_v9 = vld [vmem:[#allocation5 + $0x3b8] sm:$0xff] }
  0x7f   : > { %513 = vmatprep.subr.mxu0 %v352_v48  ;;  %584 = vmatprep.subr.mxu1 %v354_v49  ;;  %v455_v10 = vld [vmem:[#allocation5 + $0x3a0] sm:$0xff]  ;;  %v457_v11 = vld [vmem:[#allocation5 + $0x3b0] sm:$0xff]  ;;  %v452_v12 = vld [vmem:[#allocation5 + $0x388] sm:$0xff] }
  0x80   : > { %514 = vmatpush1.msra.mxu0 %v351_v50  ;;  %585 = vmatpush1.msra.mxu1 %v353_v51  ;;  %v454_v13 = vld [vmem:[#allocation5 + $0x398] sm:$0xff]  ;;  %v451_v14 = vld [vmem:[#allocation5 + $0x380] sm:$0xff]  ;;  %v453_v15 = vld [vmem:[#allocation5 + $0x390] sm:$0xff] }
  0x81   : > { %515 = vmatprep.subr.mxu0 %v348_v52  ;;  %586 = vmatprep.subr.mxu1 %v350_v53  ;;  %v448_v16 = vld [vmem:[#allocation5 + $0x368] sm:$0xff]  ;;  %v450_v17 = vld [vmem:[#allocation5 + $0x378] sm:$0xff]  ;;  %v447_v18 = vld [vmem:[#allocation5 + $0x360] sm:$0xff] }
  0x82   : > { %516 = vmatpush1.msra.mxu0 %v347_v54  ;;  %587 = vmatpush1.msra.mxu1 %v349_v55  ;;  %v449_v19 = vld [vmem:[#allocation5 + $0x370] sm:$0xff]  ;;  %v444_v20 = vld [vmem:[#allocation5 + $0x348] sm:$0xff]  ;;  %v446_v21 = vld [vmem:[#allocation5 + $0x358] sm:$0xff] }
  0x83   : > { %517 = vmatprep.subr.mxu0 %v344_v56  ;;  %588 = vmatprep.subr.mxu1 %v346_v57  ;;  %v443_v22 = vld [vmem:[#allocation5 + $0x340] sm:$0xff]  ;;  %v445_v23 = vld [vmem:[#allocation5 + $0x350] sm:$0xff]  ;;  %v440_v24 = vld [vmem:[#allocation5 + $0x328] sm:$0xff] }
  0x84   : > { %518 = vmatpush1.msra.mxu0 %v343_v58  ;;  %589 = vmatpush1.msra.mxu1 %v345_v59  ;;  %v442_v25 = vld [vmem:[#allocation5 + $0x338] sm:$0xff]  ;;  %v439_v26 = vld [vmem:[#allocation5 + $0x320] sm:$0xff]  ;;  %v441_v27 = vld [vmem:[#allocation5 + $0x330] sm:$0xff] }
  0x85   : > { %519 = vmatprep.subr.mxu0 %v340_v60  ;;  %590 = vmatprep.subr.mxu1 %v342_v61  ;;  %v436_v28 = vld [vmem:[#allocation5 + $0x308] sm:$0xff]  ;;  %v438_v29 = vld [vmem:[#allocation5 + $0x318] sm:$0xff]  ;;  %v435_v30 = vld [vmem:[#allocation5 + $0x300] sm:$0xff] }
  0x86   : > { %520 = vmatpush1.msra.mxu0 %v339_v62  ;;  %591 = vmatpush1.msra.mxu1 %v341_v63  ;;  %v437_v31 = vld [vmem:[#allocation5 + $0x310] sm:$0xff]  ;;  %v432_v32 = vld [vmem:[#allocation5 + $0x2e8] sm:$0xff]  ;;  %v434_v33 = vld [vmem:[#allocation5 + $0x2f8] sm:$0xff] }
  0x87   : > { %521 = vmatprep.subr.mxu0 %v464_v0  ;;  %592 = vmatprep.subr.mxu1 %v466_v1  ;;  %v431_v34 = vld [vmem:[#allocation5 + $0x2e0] sm:$0xff]  ;;  %v433_v35 = vld [vmem:[#allocation5 + $0x2f0] sm:$0xff]  ;;  %v428_v36 = vld [vmem:[#allocation5 + $0x2c8] sm:$0xff] }
  0x88   : > { %522 = vmatpush2.msra.mxu0 %v463_v2  ;;  %593 = vmatpush2.msra.mxu1 %v465_v3  ;;  %v430_v37 = vld [vmem:[#allocation5 + $0x2d8] sm:$0xff]  ;;  %v427_v38 = vld [vmem:[#allocation5 + $0x2c0] sm:$0xff]  ;;  %v429_v39 = vld [vmem:[#allocation5 + $0x2d0] sm:$0xff] }
  0x89   : > { %523 = vmatprep.subr.mxu0 %v460_v4  ;;  %594 = vmatprep.subr.mxu1 %v462_v5  ;;  %v424_v40 = vld [vmem:[#allocation5 + $0x2a8] sm:$0xff]  ;;  %v426_v41 = vld [vmem:[#allocation5 + $0x2b8] sm:$0xff]  ;;  %v423_v42 = vld [vmem:[#allocation5 + $0x2a0] sm:$0xff] }
  0x8a   : > { %524 = vmatpush2.msra.mxu0 %v459_v6  ;;  %595 = vmatpush2.msra.mxu1 %v461_v7  ;;  %v425_v43 = vld [vmem:[#allocation5 + $0x2b0] sm:$0xff]  ;;  %v420_v44 = vld [vmem:[#allocation5 + $0x288] sm:$0xff]  ;;  %v422_v45 = vld [vmem:[#allocation5 + $0x298] sm:$0xff] }
  0x8b   : > { %525 = vmatprep.subr.mxu0 %v456_v8  ;;  %596 = vmatprep.subr.mxu1 %v458_v9  ;;  %v419_v46 = vld [vmem:[#allocation5 + $0x280] sm:$0xff]  ;;  %v421_v47 = vld [vmem:[#allocation5 + $0x290] sm:$0xff]  ;;  %v416_v48 = vld [vmem:[#allocation5 + $0x268] sm:$0xff] }
  0x8c   : > { %526 = vmatpush2.msra.mxu0 %v455_v10  ;;  %597 = vmatpush2.msra.mxu1 %v457_v11  ;;  %v418_v49 = vld [vmem:[#allocation5 + $0x278] sm:$0xff]  ;;  %v415_v50 = vld [vmem:[#allocation5 + $0x260] sm:$0xff]  ;;  %v417_v51 = vld [vmem:[#allocation5 + $0x270] sm:$0xff] }
  0x8d   : > { %527 = vmatprep.subr.mxu0 %v452_v12  ;;  %598 = vmatprep.subr.mxu1 %v454_v13  ;;  %v412_v52 = vld [vmem:[#allocation5 + $0x248] sm:$0xff]  ;;  %v414_v53 = vld [vmem:[#allocation5 + $0x258] sm:$0xff]  ;;  %v411_v54 = vld [vmem:[#allocation5 + $0x240] sm:$0xff] }
  0x8e   : > { %528 = vmatpush2.msra.mxu0 %v451_v14  ;;  %599 = vmatpush2.msra.mxu1 %v453_v15  ;;  %v413_v55 = vld [vmem:[#allocation5 + $0x250] sm:$0xff]  ;;  %v408_v56 = vld [vmem:[#allocation5 + $0x228] sm:$0xff]  ;;  %v410_v57 = vld [vmem:[#allocation5 + $0x238] sm:$0xff] }
  0x8f   : > { %529 = vmatprep.subr.mxu0 %v448_v16  ;;  %600 = vmatprep.subr.mxu1 %v450_v17  ;;  %v407_v58 = vld [vmem:[#allocation5 + $0x220] sm:$0xff]  ;;  %v409_v59 = vld [vmem:[#allocation5 + $0x230] sm:$0xff]  ;;  %v404_v60 = vld [vmem:[#allocation5 + $0x208] sm:$0xff] }
  0x90   : > { %530 = vmatpush2.msra.mxu0 %v447_v18  ;;  %601 = vmatpush2.msra.mxu1 %v449_v19  ;;  %v406_v61 = vld [vmem:[#allocation5 + $0x218] sm:$0xff]  ;;  %v403_v62 = vld [vmem:[#allocation5 + $0x200] sm:$0xff]  ;;  %v405_v0 = vld [vmem:[#allocation5 + $0x210] sm:$0xff] }
  0x91   : > { %531 = vmatprep.subr.mxu0 %v444_v20  ;;  %602 = vmatprep.subr.mxu1 %v446_v21  ;;  %v1563_v63 = vld [vmem:[%s1548_s2 + $0x8] sm:$0xff]  ;;  %v1566_v1 = vld [vmem:[%s1548_s2] sm:$0xff]  ;;  %s1293_s2 = scalar_lea.vmem %s984_s29, 256 }
  0x92   : > { %532 = vmatpush2.msra.mxu0 %v443_v22  ;;  %603 = vmatpush2.msra.mxu1 %v445_v23  ;;  %v666_v2 = vld [vmem:[#allocation8 + $0xf8] sm:$0xff]  ;;  %v665_v4 = vld [vmem:[#allocation8 + $0xf0] sm:$0xff]  ;;  %v664_v6 = vld [vmem:[#allocation8 + $0xe8] sm:$0xff]  ;;  %p1294_p4 = scmp.ne.s32.totalorder %s984_s29, %s1293_s2  ;;  %p1301_p3 = scmp.lt.s32.totalorder %s1299_s30, %s1293_s2 }
  0x93   : > { %533 = vmatprep.subr.mxu0 %v440_v24  ;;  %604 = vmatprep.subr.mxu1 %v442_v25  ;;  %v730_v3 = vld [vmem:[#allocation8 + $0x2f8] sm:$0xff]  ;;  %v729_v5 = vld [vmem:[#allocation8 + $0x2f0] sm:$0xff]  ;;  %v728_v7 = vld [vmem:[#allocation8 + $0x2e8] sm:$0xff] }
  0x94   : > { %534 = vmatpush2.msra.mxu0 %v439_v26  ;;  %605 = vmatpush2.msra.mxu1 %v441_v27  ;;  %v663_v8 = vld [vmem:[#allocation8 + $0xe0] sm:$0xff]  ;;  %v662_v10 = vld [vmem:[#allocation8 + $0xd8] sm:$0xff]  ;;  %v661_v12 = vld [vmem:[#allocation8 + $0xd0] sm:$0xff]  ;;  %p1295_p12 = pnand %p1294_p4, %p1667_p6  ;;  %p1302_p7 = por %p1301_p3, %p1300_p5 }
  0x95   : > { %535 = vmatprep.subr.mxu0 %v436_v28  ;;  %606 = vmatprep.subr.mxu1 %v438_v29  ;;  %v727_v9 = vld [vmem:[#allocation8 + $0x2e0] sm:$0xff]  ;;  %v726_v11 = vld [vmem:[#allocation8 + $0x2d8] sm:$0xff]  ;;  %v725_v13 = vld [vmem:[#allocation8 + $0x2d0] sm:$0xff] }
  0x96   : > { %536 = vmatpush2.msra.mxu0 %v435_v30  ;;  %607 = vmatpush2.msra.mxu1 %v437_v31  ;;  %v660_v14 = vld [vmem:[#allocation8 + $0xc8] sm:$0xff]  ;;  %v659_v16 = vld [vmem:[#allocation8 + $0xc0] sm:$0xff]  ;;  %v658_v18 = vld [vmem:[#allocation8 + $0xb8] sm:$0xff]  ;;  %p1296_p0 = pneg %p1295_p12 }
  0x97   : > { %537 = vmatprep.subr.mxu0 %v432_v32  ;;  %608 = vmatprep.subr.mxu1 %v434_v33  ;;  %v724_v15 = vld [vmem:[#allocation8 + $0x2c8] sm:$0xff]  ;;  %v723_v17 = vld [vmem:[#allocation8 + $0x2c0] sm:$0xff]  ;;  %v722_v19 = vld [vmem:[#allocation8 + $0x2b8] sm:$0xff] }
  0x98   : > { %538 = vmatpush2.msra.mxu0 %v431_v34  ;;  %609 = vmatpush2.msra.mxu1 %v433_v35  ;;  %v657_v20 = vld [vmem:[#allocation8 + $0xb0] sm:$0xff]  ;;  %v656_v22 = vld [vmem:[#allocation8 + $0xa8] sm:$0xff]  ;;  %v655_v24 = vld [vmem:[#allocation8 + $0xa0] sm:$0xff]  ;;  %p1303_p9 = pnand %p1302_p7, %p1296_p0 }
  0x99   : > { %539 = vmatprep.subr.mxu0 %v428_v36  ;;  %610 = vmatprep.subr.mxu1 %v430_v37  ;;  %v721_v21 = vld [vmem:[#allocation8 + $0x2b0] sm:$0xff]  ;;  %v720_v23 = vld [vmem:[#allocation8 + $0x2a8] sm:$0xff]  ;;  %v719_v25 = vld [vmem:[#allocation8 + $0x2a0] sm:$0xff] }
  0x9a   : > { %540 = vmatpush2.msra.mxu0 %v427_v38  ;;  %611 = vmatpush2.msra.mxu1 %v429_v39  ;;  %v654_v26 = vld [vmem:[#allocation8 + $0x98] sm:$0xff]  ;;  %v653_v28 = vld [vmem:[#allocation8 + $0x90] sm:$0xff]  ;;  %v652_v30 = vld [vmem:[#allocation8 + $0x88] sm:$0xff] }
  0x9b   : > { %541 = vmatprep.subr.mxu0 %v424_v40  ;;  %612 = vmatprep.subr.mxu1 %v426_v41  ;;  %v718_v27 = vld [vmem:[#allocation8 + $0x298] sm:$0xff]  ;;  %v717_v29 = vld [vmem:[#allocation8 + $0x290] sm:$0xff]  ;;  %v716_v31 = vld [vmem:[#allocation8 + $0x288] sm:$0xff] }
  0x9c   : > { %542 = vmatpush2.msra.mxu0 %v423_v42  ;;  %613 = vmatpush2.msra.mxu1 %v425_v43  ;;  %v651_v32 = vld [vmem:[#allocation8 + $0x80] sm:$0xff]  ;;  %v650_v34 = vld [vmem:[#allocation8 + $0x78] sm:$0xff]  ;;  %v649_v36 = vld [vmem:[#allocation8 + $0x70] sm:$0xff] }
  0x9d   : > { %543 = vmatprep.subr.mxu0 %v420_v44  ;;  %614 = vmatprep.subr.mxu1 %v422_v45  ;;  %v715_v33 = vld [vmem:[#allocation8 + $0x280] sm:$0xff]  ;;  %v714_v35 = vld [vmem:[#allocation8 + $0x278] sm:$0xff]  ;;  %v713_v37 = vld [vmem:[#allocation8 + $0x270] sm:$0xff] }
  0x9e   : > { %544 = vmatpush2.msra.mxu0 %v419_v46  ;;  %615 = vmatpush2.msra.mxu1 %v421_v47  ;;  %v648_v38 = vld [vmem:[#allocation8 + $0x68] sm:$0xff]  ;;  %v647_v40 = vld [vmem:[#allocation8 + $0x60] sm:$0xff]  ;;  %v646_v42 = vld [vmem:[#allocation8 + $0x58] sm:$0xff] }
  0x9f   : > { %545 = vmatprep.subr.mxu0 %v416_v48  ;;  %616 = vmatprep.subr.mxu1 %v418_v49  ;;  %v712_v39 = vld [vmem:[#allocation8 + $0x268] sm:$0xff]  ;;  %v711_v41 = vld [vmem:[#allocation8 + $0x260] sm:$0xff]  ;;  %v710_v43 = vld [vmem:[#allocation8 + $0x258] sm:$0xff] }
  0xa0   : > { %546 = vmatpush2.msra.mxu0 %v415_v50  ;;  %617 = vmatpush2.msra.mxu1 %v417_v51  ;;  %v645_v44 = vld [vmem:[#allocation8 + $0x50] sm:$0xff]  ;;  %v644_v46 = vld [vmem:[#allocation8 + $0x48] sm:$0xff]  ;;  %v643_v48 = vld [vmem:[#allocation8 + $0x40] sm:$0xff] }
  0xa1   : > { %547 = vmatprep.subr.mxu0 %v412_v52  ;;  %618 = vmatprep.subr.mxu1 %v414_v53  ;;  %v709_v45 = vld [vmem:[#allocation8 + $0x250] sm:$0xff]  ;;  %v708_v47 = vld [vmem:[#allocation8 + $0x248] sm:$0xff]  ;;  %v707_v49 = vld [vmem:[#allocation8 + $0x240] sm:$0xff] }
  0xa2   : > { %548 = vmatpush2.msra.mxu0 %v411_v54  ;;  %619 = vmatpush2.msra.mxu1 %v413_v55  ;;  %v642_v50 = vld [vmem:[#allocation8 + $0x38] sm:$0xff]  ;;  %v641_v52 = vld [vmem:[#allocation8 + $0x30] sm:$0xff]  ;;  %v640_v54 = vld [vmem:[#allocation8 + $0x28] sm:$0xff] }
  0xa3   : > { %549 = vmatprep.subr.mxu0 %v408_v56  ;;  %620 = vmatprep.subr.mxu1 %v410_v57  ;;  %v706_v51 = vld [vmem:[#allocation8 + $0x238] sm:$0xff]  ;;  %v705_v53 = vld [vmem:[#allocation8 + $0x230] sm:$0xff]  ;;  %v704_v55 = vld [vmem:[#allocation8 + $0x228] sm:$0xff] }
  0xa4   : > { %550 = vmatpush2.msra.mxu0 %v407_v58  ;;  %621 = vmatpush2.msra.mxu1 %v409_v59  ;;  %v639_v56 = vld [vmem:[#allocation8 + $0x20] sm:$0xff]  ;;  %v638_v58 = vld [vmem:[#allocation8 + $0x18] sm:$0xff] }
  0xa5   : > { %551 = vmatprep.subr.mxu0 %v404_v60  ;;  %622 = vmatprep.subr.mxu1 %v406_v61  ;;  %v703_v57 = vld [vmem:[#allocation8 + $0x220] sm:$0xff]  ;;  %v702_v59 = vld [vmem:[#allocation8 + $0x218] sm:$0xff]  ;;  %v637_v60 = vld [vmem:[#allocation8 + $0x10] sm:$0xff] }
  0xa6   : > { %552 = vmatpush2.msra.mxu0 %v403_v62  ;;  %553 = vmatprep.mubr.f32.mxu0 %v1563_v63  ;;  %v701_v61 = vld [vmem:[#allocation8 + $0x210] sm:$0xff]  ;;  %v636_v62 = vld [vmem:[#allocation8 + $0x8] sm:$0xff] }
  0xa7   : > { %623 = vmatpush2.msra.mxu1 %v405_v0  ;;  %624 = vmatprep.mubr.f32.mxu1 %v1563_v63  ;;  %v700_v0 = vld [vmem:[#allocation8 + $0x208] sm:$0xff] }
  0xa8   : > { %554 = vmatmul.mubr.f32.vlgmr.msra.gmra.mxu0 %v1566_v1  ;;  %625 = vmatmul.mubr.f32.vlgmr.msra.gmra.mxu1 %v1566_v1 }
  0xa9   : > { %775 = vmatprep.subr.mxu0 %v666_v2  ;;  %846 = vmatprep.subr.mxu1 %v730_v3  ;;  %v635_v2 = vld [vmem:[#allocation8] sm:$0xff] }
  0xaa   : > { %776 = vmatpush1.msra.mxu0 %v665_v4  ;;  %847 = vmatpush1.msra.mxu1 %v729_v5  ;;  %v699_v3 = vld [vmem:[#allocation8 + $0x200] sm:$0xff]  ;;  %v698_v4 = vld [vmem:[#allocation8 + $0x1f8] sm:$0xff] }
  0xab   : > { %777 = vmatprep.subr.mxu0 %v664_v6  ;;  %848 = vmatprep.subr.mxu1 %v728_v7  ;;  %v762_v5 = vld [vmem:[#allocation8 + $0x3f8] sm:$0xff]  ;;  %v697_v6 = vld [vmem:[#allocation8 + $0x1f0] sm:$0xff] }
  0xac   : > { %778 = vmatpush1.msra.mxu0 %v663_v8  ;;  %849 = vmatpush1.msra.mxu1 %v727_v9  ;;  %v761_v7 = vld [vmem:[#allocation8 + $0x3f0] sm:$0xff]  ;;  %v696_v8 = vld [vmem:[#allocation8 + $0x1e8] sm:$0xff] }
  0xad   : > { %779 = vmatprep.subr.mxu0 %v662_v10  ;;  %850 = vmatprep.subr.mxu1 %v726_v11  ;;  %v760_v9 = vld [vmem:[#allocation8 + $0x3e8] sm:$0xff]  ;;  %v695_v10 = vld [vmem:[#allocation8 + $0x1e0] sm:$0xff] }
  0xae   : > { %780 = vmatpush1.msra.mxu0 %v661_v12  ;;  %851 = vmatpush1.msra.mxu1 %v725_v13  ;;  %v759_v11 = vld [vmem:[#allocation8 + $0x3e0] sm:$0xff]  ;;  %v694_v12 = vld [vmem:[#allocation8 + $0x1d8] sm:$0xff] }
  0xaf   : > { %781 = vmatprep.subr.mxu0 %v660_v14  ;;  %852 = vmatprep.subr.mxu1 %v724_v15  ;;  %v758_v13 = vld [vmem:[#allocation8 + $0x3d8] sm:$0xff]  ;;  %v693_v14 = vld [vmem:[#allocation8 + $0x1d0] sm:$0xff] }
  0xb0   : > { %782 = vmatpush1.msra.mxu0 %v659_v16  ;;  %853 = vmatpush1.msra.mxu1 %v723_v17  ;;  %v757_v15 = vld [vmem:[#allocation8 + $0x3d0] sm:$0xff]  ;;  %v692_v16 = vld [vmem:[#allocation8 + $0x1c8] sm:$0xff] }
  0xb1   : > { %783 = vmatprep.subr.mxu0 %v658_v18  ;;  %854 = vmatprep.subr.mxu1 %v722_v19  ;;  %v756_v17 = vld [vmem:[#allocation8 + $0x3c8] sm:$0xff]  ;;  %v691_v18 = vld [vmem:[#allocation8 + $0x1c0] sm:$0xff] }
  0xb2   : > { %784 = vmatpush1.msra.mxu0 %v657_v20  ;;  %855 = vmatpush1.msra.mxu1 %v721_v21  ;;  %v755_v19 = vld [vmem:[#allocation8 + $0x3c0] sm:$0xff]  ;;  %v690_v20 = vld [vmem:[#allocation8 + $0x1b8] sm:$0xff] }
  0xb3   : > { %785 = vmatprep.subr.mxu0 %v656_v22  ;;  %856 = vmatprep.subr.mxu1 %v720_v23  ;;  %v754_v21 = vld [vmem:[#allocation8 + $0x3b8] sm:$0xff]  ;;  %v689_v22 = vld [vmem:[#allocation8 + $0x1b0] sm:$0xff] }
  0xb4   : > { %786 = vmatpush1.msra.mxu0 %v655_v24  ;;  %857 = vmatpush1.msra.mxu1 %v719_v25  ;;  %v753_v23 = vld [vmem:[#allocation8 + $0x3b0] sm:$0xff]  ;;  %v688_v24 = vld [vmem:[#allocation8 + $0x1a8] sm:$0xff] }
  0xb5   : > { %787 = vmatprep.subr.mxu0 %v654_v26  ;;  %858 = vmatprep.subr.mxu1 %v718_v27  ;;  %v752_v25 = vld [vmem:[#allocation8 + $0x3a8] sm:$0xff]  ;;  %v687_v26 = vld [vmem:[#allocation8 + $0x1a0] sm:$0xff] }
  0xb6   : > { %788 = vmatpush1.msra.mxu0 %v653_v28  ;;  %859 = vmatpush1.msra.mxu1 %v717_v29  ;;  %v751_v27 = vld [vmem:[#allocation8 + $0x3a0] sm:$0xff]  ;;  %v686_v28 = vld [vmem:[#allocation8 + $0x198] sm:$0xff] }
  0xb7   : > { %789 = vmatprep.subr.mxu0 %v652_v30  ;;  %860 = vmatprep.subr.mxu1 %v716_v31  ;;  %v750_v29 = vld [vmem:[#allocation8 + $0x398] sm:$0xff]  ;;  %v685_v30 = vld [vmem:[#allocation8 + $0x190] sm:$0xff] }
  0xb8   : > { %790 = vmatpush1.msra.mxu0 %v651_v32  ;;  %861 = vmatpush1.msra.mxu1 %v715_v33  ;;  %v749_v31 = vld [vmem:[#allocation8 + $0x390] sm:$0xff]  ;;  %v684_v32 = vld [vmem:[#allocation8 + $0x188] sm:$0xff] }
  0xb9   : > { %791 = vmatprep.subr.mxu0 %v650_v34  ;;  %862 = vmatprep.subr.mxu1 %v714_v35  ;;  %v748_v33 = vld [vmem:[#allocation8 + $0x388] sm:$0xff]  ;;  %v683_v34 = vld [vmem:[#allocation8 + $0x180] sm:$0xff] }
  0xba   : > { %792 = vmatpush1.msra.mxu0 %v649_v36  ;;  %863 = vmatpush1.msra.mxu1 %v713_v37  ;;  %v747_v35 = vld [vmem:[#allocation8 + $0x380] sm:$0xff]  ;;  %v682_v36 = vld [vmem:[#allocation8 + $0x178] sm:$0xff] }
  0xbb   : > { %793 = vmatprep.subr.mxu0 %v648_v38  ;;  %864 = vmatprep.subr.mxu1 %v712_v39  ;;  %v746_v37 = vld [vmem:[#allocation8 + $0x378] sm:$0xff]  ;;  %v681_v38 = vld [vmem:[#allocation8 + $0x170] sm:$0xff] }
  0xbc   : > { %794 = vmatpush1.msra.mxu0 %v647_v40  ;;  %865 = vmatpush1.msra.mxu1 %v711_v41  ;;  %v745_v39 = vld [vmem:[#allocation8 + $0x370] sm:$0xff]  ;;  %v680_v40 = vld [vmem:[#allocation8 + $0x168] sm:$0xff] }
  0xbd   : > { %795 = vmatprep.subr.mxu0 %v646_v42  ;;  %866 = vmatprep.subr.mxu1 %v710_v43  ;;  %v744_v41 = vld [vmem:[#allocation8 + $0x368] sm:$0xff]  ;;  %v679_v42 = vld [vmem:[#allocation8 + $0x160] sm:$0xff] }
  0xbe   : > { %796 = vmatpush1.msra.mxu0 %v645_v44  ;;  %867 = vmatpush1.msra.mxu1 %v709_v45  ;;  %v743_v43 = vld [vmem:[#allocation8 + $0x360] sm:$0xff]  ;;  %v678_v44 = vld [vmem:[#allocation8 + $0x158] sm:$0xff] }
  0xbf   : > { %797 = vmatprep.subr.mxu0 %v644_v46  ;;  %868 = vmatprep.subr.mxu1 %v708_v47  ;;  %v742_v45 = vld [vmem:[#allocation8 + $0x358] sm:$0xff]  ;;  %v677_v46 = vld [vmem:[#allocation8 + $0x150] sm:$0xff] }
  0xc0   : > { %798 = vmatpush1.msra.mxu0 %v643_v48  ;;  %869 = vmatpush1.msra.mxu1 %v707_v49  ;;  %v741_v47 = vld [vmem:[#allocation8 + $0x350] sm:$0xff]  ;;  %v676_v48 = vld [vmem:[#allocation8 + $0x148] sm:$0xff] }
  0xc1   : > { %799 = vmatprep.subr.mxu0 %v642_v50  ;;  %870 = vmatprep.subr.mxu1 %v706_v51  ;;  %v740_v49 = vld [vmem:[#allocation8 + $0x348] sm:$0xff]  ;;  %v675_v50 = vld [vmem:[#allocation8 + $0x140] sm:$0xff] }
  0xc2   : > { %800 = vmatpush1.msra.mxu0 %v641_v52  ;;  %871 = vmatpush1.msra.mxu1 %v705_v53  ;;  %v739_v51 = vld [vmem:[#allocation8 + $0x340] sm:$0xff]  ;;  %v674_v52 = vld [vmem:[#allocation8 + $0x138] sm:$0xff] }
  0xc3   : > { %801 = vmatprep.subr.mxu0 %v640_v54  ;;  %872 = vmatprep.subr.mxu1 %v704_v55  ;;  %v738_v53 = vld [vmem:[#allocation8 + $0x338] sm:$0xff]  ;;  %v673_v54 = vld [vmem:[#allocation8 + $0x130] sm:$0xff] }
  0xc4   : > { %802 = vmatpush1.msra.mxu0 %v639_v56  ;;  %873 = vmatpush1.msra.mxu1 %v703_v57  ;;  %v737_v55 = vld [vmem:[#allocation8 + $0x330] sm:$0xff]  ;;  %v672_v56 = vld [vmem:[#allocation8 + $0x128] sm:$0xff] }
  0xc5   : > { %803 = vmatprep.subr.mxu0 %v638_v58  ;;  %874 = vmatprep.subr.mxu1 %v702_v59  ;;  %v736_v57 = vld [vmem:[#allocation8 + $0x328] sm:$0xff]  ;;  %v671_v58 = vld [vmem:[#allocation8 + $0x120] sm:$0xff] }
  0xc6   : > { %804 = vmatpush1.msra.mxu0 %v637_v60  ;;  %875 = vmatpush1.msra.mxu1 %v701_v61  ;;  %v735_v59 = vld [vmem:[#allocation8 + $0x320] sm:$0xff]  ;;  %v670_v60 = vld [vmem:[#allocation8 + $0x118] sm:$0xff] }
  0xc7   : > { %805 = vmatprep.subr.mxu0 %v636_v62  ;;  %876 = vmatprep.subr.mxu1 %v700_v0  ;;  %v734_v61 = vld [vmem:[#allocation8 + $0x318] sm:$0xff]  ;;  %v669_v62 = vld [vmem:[#allocation8 + $0x110] sm:$0xff] }
  0xc8   : > { %806 = vmatpush1.msra.mxu0 %v635_v2  ;;  %877 = vmatpush1.msra.mxu1 %v699_v3  ;;  %v733_v0 = vld [vmem:[#allocation8 + $0x310] sm:$0xff]  ;;  %v668_v2 = vld [vmem:[#allocation8 + $0x108] sm:$0xff] }
  0xc9   : > { %807 = vmatprep.subr.mxu0 %v698_v4  ;;  %878 = vmatprep.subr.mxu1 %v762_v5  ;;  %v732_v3 = vld [vmem:[#allocation8 + $0x308] sm:$0xff]  ;;  %v667_v4 = vld [vmem:[#allocation8 + $0x100] sm:$0xff] }
  0xca   : > { %808 = vmatpush2.msra.mxu0 %v697_v6  ;;  %879 = vmatpush2.msra.mxu1 %v761_v7  ;;  %v731_v5 = vld [vmem:[#allocation8 + $0x300] sm:$0xff]  ;;  %v469_v6 = vlaneseq }
  0xcb   : > { %809 = vmatprep.subr.mxu0 %v696_v8  ;;  %880 = vmatprep.subr.mxu1 %v760_v9 }
  0xcc   : > { %810 = vmatpush2.msra.mxu0 %v695_v10  ;;  %881 = vmatpush2.msra.mxu1 %v759_v11  ;;  %v470_v7 = vshrl.u32 %v469_v6, 7  ;;  %v467_v10 = vld [vmem:[#allocation7] sm:$0xf] }
  0xcd   : > { %811 = vmatprep.subr.mxu0 %v694_v12  ;;  %882 = vmatprep.subr.mxu1 %v758_v13 }
  0xce   : > { %812 = vmatpush2.msra.mxu0 %v693_v14  ;;  %883 = vmatpush2.msra.mxu1 %v757_v15  ;;  %v479_v8 = vsub.s32 2, %v470_v7  ;;  %v1572_v9 = vsub.s32 0, %v470_v7  ;;  %v1574_v11 = vsub.s32 1, %v470_v7  ;;  %v483_v12 = vsub.s32 3, %v470_v7 }
  0xcf   : > { %813 = vmatprep.subr.mxu0 %v692_v16  ;;  %884 = vmatprep.subr.mxu1 %v756_v17 }
  0xd0   : > { %814 = vmatpush2.msra.mxu0 %v691_v18  ;;  %885 = vmatpush2.msra.mxu1 %v755_v19  ;;  %v480_v13 = vrot.slane %v467_v10, %v479_v8  ;;  %v472_v14 = vrot.slane %v467_v10, %v1572_v9  ;;  %v476_v15 = vrot.slane %v467_v10, %v1574_v11 }
  0xd1   : > { %815 = vmatprep.subr.mxu0 %v690_v20  ;;  %886 = vmatprep.subr.mxu1 %v754_v21  ;;  %v484_v16 = vrot.slane %v467_v10, %v483_v12 }
  0xd2   : > { %816 = vmatpush2.msra.mxu0 %v689_v22  ;;  %887 = vmatpush2.msra.mxu1 %v753_v23 }
  0xd3   : > { %817 = vmatprep.subr.mxu0 %v688_v24  ;;  %888 = vmatprep.subr.mxu1 %v752_v25 }
  0xd4   : > { %818 = vmatpush2.msra.mxu0 %v687_v26  ;;  %889 = vmatpush2.msra.mxu1 %v751_v27 }
  0xd5   : > { %819 = vmatprep.subr.mxu0 %v686_v28  ;;  %890 = vmatprep.subr.mxu1 %v750_v29  ;;  %v763_v29 = vld [vmem:[%s1642_s4] sm:$0x3] }
  0xd6   : > { %820 = vmatpush2.msra.mxu0 %v685_v30  ;;  %891 = vmatpush2.msra.mxu1 %v749_v31  ;;  %v768_v30 = vrot.slane %v763_v29, %v1572_v9  ;;  %v772_v31 = vrot.slane %v763_v29, %v1574_v11 }
  0xd7   : > { %821 = vmatprep.subr.mxu0 %v684_v32  ;;  %892 = vmatprep.subr.mxu1 %v748_v33 }
  0xd8   : > { %822 = vmatpush2.msra.mxu0 %v683_v34  ;;  %893 = vmatpush2.msra.mxu1 %v747_v35 }
  0xd9   : > { %823 = vmatprep.subr.mxu0 %v682_v36  ;;  %894 = vmatprep.subr.mxu1 %v746_v37 }
  0xda   : > { %824 = vmatpush2.msra.mxu0 %v681_v38  ;;  %895 = vmatpush2.msra.mxu1 %v745_v39 }
  0xdb   : > { %825 = vmatprep.subr.mxu0 %v680_v40  ;;  %896 = vmatprep.subr.mxu1 %v744_v41 }
  0xdc   : > { %826 = vmatpush2.msra.mxu0 %v679_v42  ;;  %897 = vmatpush2.msra.mxu1 %v743_v43 }
  0xdd   : > { %827 = vmatprep.subr.mxu0 %v678_v44  ;;  %898 = vmatprep.subr.mxu1 %v742_v45 }
  0xde   : > { %828 = vmatpush2.msra.mxu0 %v677_v46  ;;  %899 = vmatpush2.msra.mxu1 %v741_v47 }
  0xdf   : > { %829 = vmatprep.subr.mxu0 %v676_v48  ;;  %900 = vmatprep.subr.mxu1 %v740_v49 }
  0xe0   : > { %830 = vmatpush2.msra.mxu0 %v675_v50  ;;  %901 = vmatpush2.msra.mxu1 %v739_v51 }
  0xe1   : > { %831 = vmatprep.subr.mxu0 %v674_v52  ;;  %902 = vmatprep.subr.mxu1 %v738_v53 }
  0xe2   : > { %832 = vmatpush2.msra.mxu0 %v673_v54  ;;  %903 = vmatpush2.msra.mxu1 %v737_v55 }
  0xe3   : > { %833 = vmatprep.subr.mxu0 %v672_v56  ;;  %904 = vmatprep.subr.mxu1 %v736_v57 }
  0xe4   : > { %834 = vmatpush2.msra.mxu0 %v671_v58  ;;  %905 = vmatpush2.msra.mxu1 %v735_v59 }
  0xe5   : > { %835 = vmatprep.subr.mxu0 %v670_v60  ;;  %906 = vmatprep.subr.mxu1 %v734_v61 }
  0xe6   : > { %836 = vmatpush2.msra.mxu0 %v669_v62  ;;  %907 = vmatpush2.msra.mxu1 %v733_v0 }
  0xe7   : > { %837 = vmatprep.subr.mxu0 %v668_v2  ;;  %908 = vmatprep.subr.mxu1 %v732_v3 }
  0xe8   : > { %838 = vmatpush2.msra.mxu0 %v667_v4  ;;  %909 = vmatpush2.msra.mxu1 %v731_v5 }
 0x168   : > { %v555_v17 = vpop.f32.mrf.mxu0  ;;  %v626_v18 = vpop.f32.mrf.mxu1 }
 0x169   : > { %v627_v19 = vadd.f32 %v626_v18, %v480_v13  ;;  %v556_v20 = vadd.f32 %v555_v17, %v472_v14 }
 0x16a   : > { %v557_v21 = vpop.f32.mrf.mxu0  ;;  %v628_v22 = vpop.f32.mrf.mxu1 }
 0x16b   : > { %v558_v23 = vadd.f32 %v557_v21, %v476_v15  ;;  %v629_v24 = vadd.f32 %v628_v22, %v484_v16  ;;  %v633_v25 = vmax.f32 %v627_v19, 0.0  ;;  %v631_v28 = vmax.f32 %v556_v20, 0.0 }
 0x16d   : > { %v632_v26 = vmax.f32 %v558_v23, 0.0  ;;  %v634_v27 = vmax.f32 %v629_v24, 0.0 }
 0x16f   : > { %839 = vmatprep.mubr.f32.mxu0 %v632_v26  ;;  %910 = vmatprep.mubr.f32.mxu1 %v634_v27 }
 0x170   : > { %840 = vmatmul.mubr.f32.vlgmr.msra.gmra.mxu0 %v631_v28  ;;  %911 = vmatmul.mubr.f32.vlgmr.msra.gmra.mxu1 %v633_v25 }
 0x230   : > { %v841_v32 = vpop.f32.mrf.mxu0  ;;  %v912_v33 = vpop.f32.mrf.mxu1 }
 0x231   : > { %v842_v34 = vadd.f32 %v841_v32, %v768_v30 }
 0x232   : > { %v843_v35 = vpop.f32.mrf.mxu0  ;;  %v914_v38 = vpop.f32.mrf.mxu1 }
 0x233   : > { %v913_v36 = vadd.f32 %v912_v33, %v842_v34  ;;  %v844_v37 = vadd.f32 %v843_v35, %v772_v31 }
 0x235   : > { %v915_v39 = vadd.f32 %v914_v38, %v844_v37  ;;  %v917_v40 = vadd.f32 %v913_v36, %v1566_v1  ;;  %v952_v1 = vld [vmem:[%s1644_s6] sm:$0x3] }
 0x236   : > { %v957_v61 = vrot.slane %v952_v1, %v1572_v9  ;;  %v961_v62 = vrot.slane %v952_v1, %v1574_v11 }
 0x237   : > { %v918_v41 = vadd.f32 %v915_v39, %v1563_v63  ;;  %v923_v44 = vmul.f32 %v917_v40, %v917_v40  ;;  %v938_v63 = vld [vmem:[%s1643_s5] sm:$0x3] }
 0x238   : > { %v943_v56 = vrot.slane %v938_v63, %v1572_v9  ;;  %v947_v57 = vrot.slane %v938_v63, %v1574_v11 }
 0x239   : > { %v919_v42 = vadd.f32 %v918_v41, %v917_v40  ;;  %v924_v43 = vmul.f32 %v918_v41, %v918_v41 }
 0x23b   : > { %920 = vadd.xlane.f32.xlu0 %v919_v42  ;;  %v925_v45 = vadd.f32 %v924_v43, %v923_v44 }
 0x23f   : > { %926 = vadd.xlane.f32.xlu0 %v925_v45 }
 0x2c4   : > { %v921_v46 = vpop.xlane.xlu0 %920 }
 0x2c5   : > { %v922_v47 = vmul.f32 0.00390625, %v921_v46 }
 0x2c7   : > { %v929_v49 = vmul.f32 %v922_v47, %v922_v47  ;;  %v932_v54 = vsub.f32 %v917_v40, %v922_v47  ;;  %v933_v55 = vsub.f32 %v918_v41, %v922_v47 }
 0x2c8   : > { %v927_v48 = vpop.xlane.xlu0 %926 }
 0x2c9   : > { %v928_v50 = vmul.f32 0.00390625, %v927_v48 }
 0x2cb   : > { %v930_v51 = vsub.f32 %v928_v50, %v929_v49 }
 0x2cd   : > { %v931_v52 = vmax.f32 %v930_v51, 0.0 }
 0x2cf   : > { %v934_v53 = vadd.f32 1e-05, %v931_v52 }
 0x2d1   : > { %1185 = vrsqrt.f32 %v934_v53 }
 0x2de   : > { %v1186_v58 = vpop.eup %1185 }
 0x2df   : > { %v936_v59 = vmul.f32 %v1186_v58, %v932_v54  ;;  %v937_v60 = vmul.f32 %v1186_v58, %v933_v55 }
 0x2e1   : > { %v950_v0 = vmul.f32 %v943_v56, %v936_v59  ;;  %v951_v2 = vmul.f32 %v947_v57, %v937_v60 }
 0x2e3   : > { %v964_v3 = vadd.f32 %v957_v61, %v950_v0  ;;  %v965_v4 = vadd.f32 %v961_v62, %v951_v2 }
 0x2e5   : > { %966 = vst [vmem:[%s336_s23] sm:$0xff] %v964_v3  ;;  %967 = vst [vmem:[%s336_s23 + $0x8] sm:$0xff] %v965_v4 }
 0x2e6   : > { %1306 = shalt.err (!%p1303_p9)
}
 0x2e7   : > { %s1307_s9 = scalar_lea.hbm %s1601_s12, 256  ;;  %s1311_s13 = scalar_lea.hbm %s1645_s7, 512 }
 0x2e8   : > { %p1308_p13 = scmp.ne.s32.totalorder %s1601_s12, %s1307_s9  ;;  %p1312_p11 = scmp.lt.s32.totalorder %s1601_s12, %s1645_s7 }
 0x2e9   : > { %p1313_p1 = scmp.lt.s32.totalorder %s1311_s13, %s1307_s9 }
 0x2ea   : > { %p1309_p8 = pnand %p1308_p13, %p1667_p6 }
 0x2eb   : > { %p1314_p2 = por %p1313_p1, %p1312_p11 }
 0x2ec   : > { %p1310_p10 = pneg %p1309_p8 }
 0x2ee   : > { %p1315_p4 = pnand %p1314_p2, %p1310_p10 }
 0x2f0   : > { %1318 = shalt.err (!%p1315_p4)
}
 0x2f1   : > { %1118 = dma.vmem_to_hbm [thread:$0]  (%p1667_p6), %s984_s29, 256, %s1601_s12, %s969_s1  }
 0x2f2 PF: > { %s995_s22 = sand.u32 1, %s1353_s24   ;;  %p1668_p12 = scmp.ne.s32.totalorder %s1653_s8, 0 }
 0x2f3   : > { %p1669_p0 = scmp.ge.s32.totalorder %s1365_s27, 2  ;;  %s996_s23 = scalar_lea.sflag [#allocation4], %s995_s22 }
 0x2f5   : > { %p1135_p5 = pnand %p1669_p0, %p1668_p12 }
 0x2f7   : > { %p1136_p3 = pneg %p1135_p5 }
 0x2f9   : > { %1348 = dma.done.wait (%p1136_p3), %s996_s23, 256  }
 0x2fa   : > { %1350 = vsyncadd (%p1136_p3), %s996_s23, 4294967040  ;;  %p22_p7 = scmp.ge.s32.totalorder %s1496_s17, 4   ;;  %s1670_s24 = smov %s1357_s25 }
 0x2fb   : > { %s1671_s25 = smov %s1361_s26  ;;  %s1672_s26 = smov %s1506_s20 }
 0x2fc   : > { %s1673_s27 = smov %s1496_s17  ;;  %24 = sbr.rel (!%p22_p7) target bundleno = 10 (0xa), region = 105 }
 0x301   :  { %1001 = vsyncpa [#allocation3], 1 }
 0x302   :  { %1003 = vsyncpa [#allocation3 + $0x1], 1 }
 0x303   :  { %1004 = vsyncpa [#allocation6], 1 }
 0x304   :  { %1005 = vsyncpa [#allocation9], 1 }
 0x305   :  { %1006 = vsyncpa [#allocation4], 1 }
 0x306   :  { %1008 = vsyncpa [#allocation4 + $0x1], 1 }

// kernel: tpu_custom_call.1
= control target key start
LH: loop header
LB: loop body
LE: loop exit
PB: predicated region body
PF: predicated region fallthrough
CT: control target
= control target key end

     0   :  { %s1638_s0 = inlined_call_operand.hbm [shape: f32[16,256], index: 0, kind: input, shape index: {}]   ;;  %s1639_s1 = inlined_call_operand.hbm [shape: f32[256,512], index: 1, kind: input, shape index: {}]   ;;  %s1640_s2 = inlined_call_operand.hbm [shape: f32[1,512], index: 2, kind: input, shape index: {}]   ;;  %s1641_s3 = inlined_call_operand.hbm [shape: f32[512,256], index: 3, kind: input, shape index: {}]   ;;  %s1642_s4 = inlined_call_operand.vmem [shape: f32[1,256], index: 4, kind: input, shape index: {}]   ;;  %s1643_s5 = inlined_call_operand.vmem [shape: f32[1,256], index: 5, kind: input, shape index: {}]   ;;  %s1644_s6 = inlined_call_operand.vmem [shape: f32[1,256], index: 6, kind: input, shape index: {}]   ;;  %s1645_s7 = inlined_call_operand.hbm [shape: f32[16,256], index: 7, kind: output, shape index: {}]  }
   0x1   :  { %1650 = sst [smem:[#allocation15_spill]] %s1639_s1 }
   0x2   :  { %1651 = sst [smem:[#allocation16_spill]] %s1640_s2 }
   0x3   :  { %12 = vsyncpa [#allocation3], 0 }
   0x4   :  { %14 = vsyncpa [#allocation3 + $0x1], 0 }
   0x5   :  { %15 = vsyncpa [#allocation6], 0 }
   0x6   :  { %16 = vsyncpa [#allocation9], 0 }
   0x7   :  { %17 = vsyncpa [#allocation4], 0 }
   0x8   :  { %19 = vsyncpa [#allocation4 + $0x1], 0  ;;  %s1416_s24 = smov 0   ;;  %s1418_s25 = smov 0  }
   0x9   :  { %s1420_s26 = smov 0   ;;  %s1422_s27 = smov 0  }
   0xa LB: > { %s1437_s28 = sadd.s32 4294967295, %s1365_s27   ;;  %s1082_s29 = sadd.s32 4294967294, %s1365_s27   ;;  %s1365_s27 = sphi %s1422_s27, %s1673_s27   ;;  %s1361_s26 = sphi %s1420_s26, %s1672_s26   ;;  %s1357_s25 = sphi %s1418_s25, %s1671_s25   ;;  %s1353_s24 = sphi %s1416_s24, %s1670_s24  }
   0xb   : > { %p45_p0 = scmp.ne.s32.totalorder %s1357_s25, %s1353_s24  ;;  %p1646_p1 = scmp.eq.s32.totalorder %s1437_s28, 0 }
   0xc   : > { %p201_p3 = scmp.eq.s32.totalorder %s1082_s29, 1  ;;  %p1083_p5 = scmp.ge.s32.totalorder %s1365_s27, 1 }
   0xd   : > { %p1446_p4 = por %p1646_p1, %p45_p0  ;;  %p208_p7 = scmp.lt.s32.totalorder %s1365_s27, 3 }
   0xe   : > { %p1451_p6 = por %p201_p3, %p45_p0  ;;  %s1367_s10 = smov [#allocation5]  }
   0xf   : > { %s1652_s30 = scalar_select %p1446_p4, 1, 0 }
  0x10   : > { %s1653_s8 = scalar_select %p1451_p6, 1, 0 }
  0x11   : > { %p1456_p8 = pnand %p1083_p5, %p208_p7  ;;  %s220_s11 = sshll.u32 %s1367_s10, 4  ;;  %s221_s11 = int_to_ptr.vmem [resolvable:$true] %s220_s11 }
  0x12   : > { %s1368_s13 = smov [#allocation7]   ;;  %s1369_s15 = smov [#allocation8]  }
  0x13   : > { %s1654_s9 = scalar_select %p1456_p8, 1, 0 }
  0x14   : > { %p1120_p9 = pneg %p1456_p8  ;;  %s234_s14 = sshll.u32 %s1368_s13, 4  ;;  %s235_s14 = int_to_ptr.vmem [resolvable:$true] %s234_s14 }
  0x15   : > { %s244_s16 = sshll.u32 %s1369_s15, 4  ;;  %s1198_s17 = scalar_lea.vmem %s221_s11, 16384  ;;  %s245_s16 = int_to_ptr.vmem [resolvable:$true] %s244_s16 }
  0x16   : > { %p1465_p11 = pnand %p1120_p9, %p1646_p1  ;;  %p1199_p13 = scmp.ne.s32.totalorder %s221_s11, %s1198_s17 }
  0x17   : > { %p1206_p5 = scmp.lt.s32.totalorder %s221_s11, %s221_s11  ;;  %p1207_p7 = scmp.lt.s32.totalorder %s1198_s17, %s1198_s17 }
  0x18   : > { %p1189_p12 = pneg %p1465_p11 }
  0x19   : > { %p1208_p9 = por %p1207_p7, %p1206_p5 }
  0x1a   : > { %p1201_p0 = pnand %p1199_p13, %p1189_p12 }
  0x1c   : > { %p1202_p3 = pneg %p1201_p0 }
  0x1e   : > { %p1209_p10 = pnand %p1208_p9, %p1202_p3 }
  0x20   : > { %1212 = shalt.err (!%p1209_p10)
}
  0x21   : > { %s1370_s18 = smov 512   ;;  %s1371_s19 = smov 32  }
  0x22   : > { %s1656_s1 = sld [smem:[#allocation15_spill]]  ;;  %s1224_s22 = scalar_lea.vmem %s235_s14, 64 }
  0x23   : > { %p1225_p1 = scmp.ne.s32.totalorder %s235_s14, %s1224_s22  ;;  %p1232_p2 = scmp.lt.s32.totalorder %s235_s14, %s235_s14 }
  0x24   : > { %p1233_p6 = scmp.lt.s32.totalorder %s1224_s22, %s1224_s22 }
  0x25   : > { %p1227_p13 = pnand %p1225_p1, %p1189_p12 }
  0x26   : > { %p1234_p5 = por %p1233_p6, %p1232_p2 }
  0x27   : > { %p1228_p0 = pneg %p1227_p13 }
  0x28   : > { %1123 = dma.hbm_to_vmem [thread:$0]  (!%p1465_p11), %s1656_s1, 16384, %s221_s11, [#allocation6], %s1370_s18, %s1370_s18, %s1371_s19  }
  0x29   : > { %p1235_p3 = pnand %p1234_p5, %p1228_p0 }
  0x2b   : > { %1238 = shalt.err (!%p1235_p3)
}
  0x2c   : > { %s1657_s2 = sld [smem:[#allocation16_spill]]  ;;  %s1250_s10 = scalar_lea.vmem %s245_s16, 16384 }
  0x2d   : > { %p1251_p10 = scmp.ne.s32.totalorder %s245_s16, %s1250_s10  ;;  %p1258_p9 = scmp.lt.s32.totalorder %s245_s16, %s245_s16 }
  0x2e   : > { %p1259_p13 = scmp.lt.s32.totalorder %s1250_s10, %s1250_s10 }
  0x2f   : > { %p1253_p7 = pnand %p1251_p10, %p1189_p12 }
  0x30   : > { %p1260_p4 = por %p1259_p13, %p1258_p9 }
  0x31   : > { %p1254_p1 = pneg %p1253_p7 }
  0x32   : > { %1126 = dma.hbm_to_vmem [thread:$0]  (!%p1465_p11), %s1657_s2, 64, %s235_s14, [#allocation6]  }
  0x33   : > { %p1261_p2 = pnand %p1260_p4, %p1254_p1 }
  0x35   : > { %1264 = shalt.err (!%p1261_p2)
}
  0x36   : > { %s1372_s11 = smov 256   ;;  %s1373_s13 = smov 16  }
  0x37   : > { %1129 = dma.hbm_to_vmem [thread:$0]  (!%p1465_p11), %s1641_s3, 16384, %s245_s16, [#allocation9], %s1372_s11, %s1372_s11, %s1373_s13  }
  0x38   : > { %s1496_s17 = sadd.s32 1, %s1365_s27   ;;  %s32_s19 = sadd.s32 1, %s1361_s26 }
  0x39   : > { %s29_s18 = ssub.s32 %s1365_s27, %s1496_s17  ;;  %p39_p6 = scmp.ne.s32.totalorder %s1361_s26, %s1357_s25 }
  0x3a   : > { %p30_p4 = scmp.eq.s32.totalorder %s29_s18, 0  ;;  %p40_p12 = scmp.eq.s32.totalorder %s1365_s27, 0 }
  0x3b   : > { %p1141_p0 = scmp.lt.s32.totalorder %s1365_s27, 2  ;;  %p1658_p3 = scmp.eq.s32.totalorder %s1437_s28, 1 }
  0x3c   : > { %s1506_s20 = scalar_select %p30_p4, %s1361_s26, %s32_s19  }
  0x3d   : > { %p41_p5 = por %p40_p12, %p39_p6  ;;  %p1510_p10 = por %p1658_p3, %p39_p6 }
  0x3e   : > { %s267_s12 = sand.u32 1, %s1361_s26   ;;  %s1102_s22 = sshll.u32 %s1365_s27, 8 }
  0x3f   : > { %s1659_s21 = scalar_select %p1510_p10, 1, 0 }
  0x40   : > { %s1088_s16 = sshll.u32 %s267_s12, 4  ;;  %s1519_s10 = scalar_lea.hbm %s1638_s0, %s1102_s22 }
  0x41   : > { %s271_s11 = scalar_lea.vmem [#allocation2], %s1088_s16  ;;  %p1521_p11 = pnand %p1141_p0, %p41_p5 }
  0x42   : > { %s279_s13 = sshll.u32 %s271_s11, 4  ;;  %s268_s15 = scalar_lea.sflag [#allocation3], %s267_s12  ;;  %s280_s13 = int_to_ptr.vmem [resolvable:$true] %s279_s13 }
  0x43   : > { %s1265_s18 = scalar_lea.hbm %s1519_s10, 256  ;;  %p1267_p1 = pneg %p1521_p11 }
  0x44   : > { %p1266_p7 = scmp.ne.s32.totalorder %s1519_s10, %s1265_s18  ;;  %s1270_s23 = scalar_lea.hbm %s1638_s0, 512 }
  0x45   : > { %p1271_p2 = scmp.lt.s32.totalorder %s1519_s10, %s1638_s0  ;;  %p1272_p4 = scmp.lt.s32.totalorder %s1270_s23, %s1265_s18 }
  0x46   : > { %p1268_p9 = pnand %p1267_p1, %p1266_p7 }
  0x47   : > { %p1273_p6 = por %p1272_p4, %p1271_p2 }
  0x48   : > { %p1269_p13 = pneg %p1268_p9 }
  0x4a   : > { %p1274_p12 = pnand %p1273_p6, %p1269_p13 }
  0x4c   : > { %1277 = shalt.err (!%p1274_p12)
}
  0x4d   : > { %s1278_s11 = scalar_lea.vmem %s280_s13, 256  ;;  %s1374_s12 = smov [#allocation2]  }
  0x4e   : > { %p1279_p0 = scmp.ne.s32.totalorder %s280_s13, %s1278_s11  ;;  %s1283_s1 = sshll.u32 %s1374_s12, 4  ;;  %s1284_s1 = int_to_ptr.vmem [resolvable:$false] %s1283_s1 }
  0x4f   : > { %s1285_s2 = scalar_lea.vmem %s1284_s1, 512  ;;  %p1286_p7 = scmp.lt.s32.totalorder %s280_s13, %s1284_s1 }
  0x50   : > { %p1281_p5 = pnand %p1279_p0, %p1267_p1  ;;  %p1287_p9 = scmp.lt.s32.totalorder %s1285_s2, %s1278_s11 }
  0x52   : > { %p1282_p3 = pneg %p1281_p5  ;;  %p1288_p10 = por %p1287_p9, %p1286_p7 }
  0x54   : > { %p1289_p8 = pnand %p1288_p10, %p1282_p3 }
  0x56   : > { %1292 = shalt.err (!%p1289_p8)
}
  0x57   : > { %1133 = dma.hbm_to_vmem [thread:$0]  (!%p1521_p11), %s1519_s10, 256, %s280_s13, %s268_s15  }
  0x58   : > { %p1661_p13 = scmp.ne.s32.totalorder %s1654_s9, 0 }
  0x59   : > { %s1542_s18 = sand.u32 (!%p1661_p13), 1, %s1357_s25   ;;  %p1662_p8 = scmp.ne.s32.totalorder (!%p1661_p13), %s1652_s30, 0 }
  0x5a   : > { %288 = sbr.rel (%p1661_p13) target bundleno = 754 (0x2f2), region = 48  ;;  %s1092_s19 = sshll.u32 (!%p1661_p13), %s1542_s18, 4 }
  0x5b   : > { %s291_s1 = scalar_lea.sflag (!%p1661_p13), [#allocation3], %s1542_s18  ;;  %s1548_s2 = scalar_lea.vmem (!%p1661_p13), [#allocation2], %s1092_s19 }
  0x5f   : > { %1336 = dma.done.wait (%p1662_p8), %s291_s1, 256  }
  0x60   : > { %1338 = vsyncadd (%p1662_p8), %s291_s1, 4294967040  ;;  %p1663_p10 = scmp.eq.s32.totalorder %s1437_s28, 0 }
  0x62   : > { %1340 = dma.done.wait (%p1663_p10), [#allocation6], 16448   ;;  %p1664_p11 = pmov %p1663_p10 }
  0x63   : > { %p1665_p1 = pmov %p1663_p10 }
  0x64   : > { %1342 = vsyncadd (%p1664_p11), [#allocation6], 4294950848 }
  0x65   : > { %1344 = dma.done.wait (%p1665_p1), [#allocation9], 16384   ;;  %p1666_p2 = pmov %p1665_p1 }
  0x66   : > { %v400_v0 = vld [vmem:[#allocation5 + $0x1e8] sm:$0xff]  ;;  %v402_v1 = vld [vmem:[#allocation5 + $0x1f8] sm:$0xff]  ;;  %v399_v2 = vld [vmem:[#allocation5 + $0x1e0] sm:$0xff]  ;;  %s1103_s22 = sshll.u32 %s1437_s28, 8  ;;  %s336_s23 = scalar_lea.vmem [#allocation10], %s1092_s19 }
  0x67   : > { %1346 = vsyncadd (%p1666_p2), [#allocation9], 4294950912  ;;  %489 = vmatprep.subr.mxu0 %v400_v0  ;;  %560 = vmatprep.subr.mxu1 %v402_v1  ;;  %v401_v3 = vld [vmem:[#allocation5 + $0x1f0] sm:$0xff]  ;;  %v396_v4 = vld [vmem:[#allocation5 + $0x1c8] sm:$0xff]  ;;  %s983_s29 = sshll.u32 %s336_s23, 4  ;;  %s1601_s12 = scalar_lea.hbm %s1645_s7, %s1103_s22  ;;  %s984_s29 = int_to_ptr.vmem [resolvable:$true] %s983_s29 }
  0x68   : > { %v398_v5 = vld [vmem:[#allocation5 + $0x1d8] sm:$0xff]  ;;  %490 = vmatpush1.msra.mxu0 %v399_v2  ;;  %561 = vmatpush1.msra.mxu1 %v401_v3  ;;  %v395_v6 = vld [vmem:[#allocation5 + $0x1c0] sm:$0xff]  ;;  %v397_v7 = vld [vmem:[#allocation5 + $0x1d0] sm:$0xff]  ;;  %s969_s1 = scalar_lea.sflag [#allocation4], %s1542_s18  ;;  %p1667_p6 = scmp.ne.s32.totalorder %s1659_s21, 0 }
  0x69   : > { %v392_v8 = vld [vmem:[#allocation5 + $0x1a8] sm:$0xff]  ;;  %491 = vmatprep.subr.mxu0 %v396_v4  ;;  %562 = vmatprep.subr.mxu1 %v398_v5  ;;  %v394_v9 = vld [vmem:[#allocation5 + $0x1b8] sm:$0xff]  ;;  %v391_v10 = vld [vmem:[#allocation5 + $0x1a0] sm:$0xff]  ;;  %s1375_s28 = smov [#allocation10]  }
  0x6a   : > { %v393_v11 = vld [vmem:[#allocation5 + $0x1b0] sm:$0xff]  ;;  %492 = vmatpush1.msra.mxu0 %v395_v6  ;;  %563 = vmatpush1.msra.mxu1 %v397_v7  ;;  %v388_v12 = vld [vmem:[#allocation5 + $0x188] sm:$0xff]  ;;  %v390_v13 = vld [vmem:[#allocation5 + $0x198] sm:$0xff]  ;;  %s1297_s19 = sshll.u32 %s1375_s28, 4  ;;  %s1298_s19 = int_to_ptr.vmem [resolvable:$false] %s1297_s19 }
  0x6b   : > { %493 = vmatprep.subr.mxu0 %v392_v8  ;;  %564 = vmatprep.subr.mxu1 %v394_v9  ;;  %v387_v14 = vld [vmem:[#allocation5 + $0x180] sm:$0xff]  ;;  %v389_v15 = vld [vmem:[#allocation5 + $0x190] sm:$0xff]  ;;  %v384_v16 = vld [vmem:[#allocation5 + $0x168] sm:$0xff]  ;;  %s1299_s30 = scalar_lea.vmem %s1298_s19, 512  ;;  %p1300_p5 = scmp.lt.s32.totalorder %s984_s29, %s1298_s19 }
  0x6c   : > { %494 = vmatpush1.msra.mxu0 %v391_v10  ;;  %565 = vmatpush1.msra.mxu1 %v393_v11  ;;  %v386_v17 = vld [vmem:[#allocation5 + $0x178] sm:$0xff]  ;;  %v383_v18 = vld [vmem:[#allocation5 + $0x160] sm:$0xff]  ;;  %v385_v19 = vld [vmem:[#allocation5 + $0x170] sm:$0xff] }
  0x6d   : > { %495 = vmatprep.subr.mxu0 %v388_v12  ;;  %566 = vmatprep.subr.mxu1 %v390_v13  ;;  %v380_v20 = vld [vmem:[#allocation5 + $0x148] sm:$0xff]  ;;  %v382_v21 = vld [vmem:[#allocation5 + $0x158] sm:$0xff]  ;;  %v379_v22 = vld [vmem:[#allocation5 + $0x140] sm:$0xff] }
  0x6e   : > { %496 = vmatpush1.msra.mxu0 %v387_v14  ;;  %567 = vmatpush1.msra.mxu1 %v389_v15  ;;  %v381_v23 = vld [vmem:[#allocation5 + $0x150] sm:$0xff]  ;;  %v376_v24 = vld [vmem:[#allocation5 + $0x128] sm:$0xff]  ;;  %v378_v25 = vld [vmem:[#allocation5 + $0x138] sm:$0xff] }
  0x6f   : > { %497 = vmatprep.subr.mxu0 %v384_v16  ;;  %568 = vmatprep.subr.mxu1 %v386_v17  ;;  %v375_v26 = vld [vmem:[#allocation5 + $0x120] sm:$0xff]  ;;  %v377_v27 = vld [vmem:[#allocation5 + $0x130] sm:$0xff]  ;;  %v372_v28 = vld [vmem:[#allocation5 + $0x108] sm:$0xff] }
  0x70   : > { %498 = vmatpush1.msra.mxu0 %v383_v18  ;;  %569 = vmatpush1.msra.mxu1 %v385_v19  ;;  %v374_v29 = vld [vmem:[#allocation5 + $0x118] sm:$0xff]  ;;  %v371_v30 = vld [vmem:[#allocation5 + $0x100] sm:$0xff]  ;;  %v373_v31 = vld [vmem:[#allocation5 + $0x110] sm:$0xff] }
  0x71   : > { %499 = vmatprep.subr.mxu0 %v380_v20  ;;  %570 = vmatprep.subr.mxu1 %v382_v21  ;;  %v368_v32 = vld [vmem:[#allocation5 + $0xe8] sm:$0xff]  ;;  %v370_v33 = vld [vmem:[#allocation5 + $0xf8] sm:$0xff]  ;;  %v367_v34 = vld [vmem:[#allocation5 + $0xe0] sm:$0xff] }
  0x72   : > { %500 = vmatpush1.msra.mxu0 %v379_v22  ;;  %571 = vmatpush1.msra.mxu1 %v381_v23  ;;  %v369_v35 = vld [vmem:[#allocation5 + $0xf0] sm:$0xff]  ;;  %v364_v36 = vld [vmem:[#allocation5 + $0xc8] sm:$0xff]  ;;  %v366_v37 = vld [vmem:[#allocation5 + $0xd8] sm:$0xff] }
  0x73   : > { %501 = vmatprep.subr.mxu0 %v376_v24  ;;  %572 = vmatprep.subr.mxu1 %v378_v25  ;;  %v363_v38 = vld [vmem:[#allocation5 + $0xc0] sm:$0xff]  ;;  %v365_v39 = vld [vmem:[#allocation5 + $0xd0] sm:$0xff]  ;;  %v360_v40 = vld [vmem:[#allocation5 + $0xa8] sm:$0xff] }
  0x74   : > { %502 = vmatpush1.msra.mxu0 %v375_v26  ;;  %573 = vmatpush1.msra.mxu1 %v377_v27  ;;  %v362_v41 = vld [vmem:[#allocation5 + $0xb8] sm:$0xff]  ;;  %v359_v42 = vld [vmem:[#allocation5 + $0xa0] sm:$0xff]  ;;  %v361_v43 = vld [vmem:[#allocation5 + $0xb0] sm:$0xff] }
  0x75   : > { %503 = vmatprep.subr.mxu0 %v372_v28  ;;  %574 = vmatprep.subr.mxu1 %v374_v29  ;;  %v356_v44 = vld [vmem:[#allocation5 + $0x88] sm:$0xff]  ;;  %v358_v45 = vld [vmem:[#allocation5 + $0x98] sm:$0xff]  ;;  %v355_v46 = vld [vmem:[#allocation5 + $0x80] sm:$0xff] }
  0x76   : > { %504 = vmatpush1.msra.mxu0 %v371_v30  ;;  %575 = vmatpush1.msra.mxu1 %v373_v31  ;;  %v357_v47 = vld [vmem:[#allocation5 + $0x90] sm:$0xff]  ;;  %v352_v48 = vld [vmem:[#allocation5 + $0x68] sm:$0xff]  ;;  %v354_v49 = vld [vmem:[#allocation5 + $0x78] sm:$0xff] }
  0x77   : > { %505 = vmatprep.subr.mxu0 %v368_v32  ;;  %576 = vmatprep.subr.mxu1 %v370_v33  ;;  %v351_v50 = vld [vmem:[#allocation5 + $0x60] sm:$0xff]  ;;  %v353_v51 = vld [vmem:[#allocation5 + $0x70] sm:$0xff]  ;;  %v348_v52 = vld [vmem:[#allocation5 + $0x48] sm:$0xff] }
  0x78   : > { %506 = vmatpush1.msra.mxu0 %v367_v34  ;;  %577 = vmatpush1.msra.mxu1 %v369_v35  ;;  %v350_v53 = vld [vmem:[#allocation5 + $0x58] sm:$0xff]  ;;  %v347_v54 = vld [vmem:[#allocation5 + $0x40] sm:$0xff]  ;;  %v349_v55 = vld [vmem:[#allocation5 + $0x50] sm:$0xff] }
  0x79   : > { %507 = vmatprep.subr.mxu0 %v364_v36  ;;  %578 = vmatprep.subr.mxu1 %v366_v37  ;;  %v344_v56 = vld [vmem:[#allocation5 + $0x28] sm:$0xff]  ;;  %v346_v57 = vld [vmem:[#allocation5 + $0x38] sm:$0xff]  ;;  %v343_v58 = vld [vmem:[#allocation5 + $0x20] sm:$0xff] }
  0x7a   : > { %508 = vmatpush1.msra.mxu0 %v363_v38  ;;  %579 = vmatpush1.msra.mxu1 %v365_v39  ;;  %v345_v59 = vld [vmem:[#allocation5 + $0x30] sm:$0xff]  ;;  %v340_v60 = vld [vmem:[#allocation5 + $0x8] sm:$0xff]  ;;  %v342_v61 = vld [vmem:[#allocation5 + $0x18] sm:$0xff] }
  0x7b   : > { %509 = vmatprep.subr.mxu0 %v360_v40  ;;  %580 = vmatprep.subr.mxu1 %v362_v41  ;;  %v339_v62 = vld [vmem:[#allocation5] sm:$0xff]  ;;  %v341_v63 = vld [vmem:[#allocation5 + $0x10] sm:$0xff]  ;;  %v464_v0 = vld [vmem:[#allocation5 + $0x3e8] sm:$0xff] }
  0x7c   : > { %510 = vmatpush1.msra.mxu0 %v359_v42  ;;  %581 = vmatpush1.msra.mxu1 %v361_v43  ;;  %v466_v1 = vld [vmem:[#allocation5 + $0x3f8] sm:$0xff]  ;;  %v463_v2 = vld [vmem:[#allocation5 + $0x3e0] sm:$0xff]  ;;  %v465_v3 = vld [vmem:[#allocation5 + $0x3f0] sm:$0xff] }
  0x7d   : > { %511 = vmatprep.subr.mxu0 %v356_v44  ;;  %582 = vmatprep.subr.mxu1 %v358_v45  ;;  %v460_v4 = vld [vmem:[#allocation5 + $0x3c8] sm:$0xff]  ;;  %v462_v5 = vld [vmem:[#allocation5 + $0x3d8] sm:$0xff]  ;;  %v459_v6 = vld [vmem:[#allocation5 + $0x3c0] sm:$0xff] }
  0x7e   : > { %512 = vmatpush1.msra.mxu0 %v355_v46  ;;  %583 = vmatpush1.msra.mxu1 %v357_v47  ;;  %v461_v7 = vld [vmem:[#allocation5 + $0x3d0] sm:$0xff]  ;;  %v456_v8 = vld [vmem:[#allocation5 + $0x3a8] sm:$0xff]  ;;  %v458_v9 = vld [vmem:[#allocation5 + $0x3b8] sm:$0xff] }
  0x7f   : > { %513 = vmatprep.subr.mxu0 %v352_v48  ;;  %584 = vmatprep.subr.mxu1 %v354_v49  ;;  %v455_v10 = vld [vmem:[#allocation5 + $0x3a0] sm:$0xff]  ;;  %v457_v11 = vld [vmem:[#allocation5 + $0x3b0] sm:$0xff]  ;;  %v452_v12 = vld [vmem:[#allocation5 + $0x388] sm:$0xff] }
  0x80   : > { %514 = vmatpush1.msra.mxu0 %v351_v50  ;;  %585 = vmatpush1.msra.mxu1 %v353_v51  ;;  %v454_v13 = vld [vmem:[#allocation5 + $0x398] sm:$0xff]  ;;  %v451_v14 = vld [vmem:[#allocation5 + $0x380] sm:$0xff]  ;;  %v453_v15 = vld [vmem:[#allocation5 + $0x390] sm:$0xff] }
  0x81   : > { %515 = vmatprep.subr.mxu0 %v348_v52  ;;  %586 = vmatprep.subr.mxu1 %v350_v53  ;;  %v448_v16 = vld [vmem:[#allocation5 + $0x368] sm:$0xff]  ;;  %v450_v17 = vld [vmem:[#allocation5 + $0x378] sm:$0xff]  ;;  %v447_v18 = vld [vmem:[#allocation5 + $0x360] sm:$0xff] }
  0x82   : > { %516 = vmatpush1.msra.mxu0 %v347_v54  ;;  %587 = vmatpush1.msra.mxu1 %v349_v55  ;;  %v449_v19 = vld [vmem:[#allocation5 + $0x370] sm:$0xff]  ;;  %v444_v20 = vld [vmem:[#allocation5 + $0x348] sm:$0xff]  ;;  %v446_v21 = vld [vmem:[#allocation5 + $0x358] sm:$0xff] }
  0x83   : > { %517 = vmatprep.subr.mxu0 %v344_v56  ;;  %588 = vmatprep.subr.mxu1 %v346_v57  ;;  %v443_v22 = vld [vmem:[#allocation5 + $0x340] sm:$0xff]  ;;  %v445_v23 = vld [vmem:[#allocation5 + $0x350] sm:$0xff]  ;;  %v440_v24 = vld [vmem:[#allocation5 + $0x328] sm:$0xff] }
  0x84   : > { %518 = vmatpush1.msra.mxu0 %v343_v58  ;;  %589 = vmatpush1.msra.mxu1 %v345_v59  ;;  %v442_v25 = vld [vmem:[#allocation5 + $0x338] sm:$0xff]  ;;  %v439_v26 = vld [vmem:[#allocation5 + $0x320] sm:$0xff]  ;;  %v441_v27 = vld [vmem:[#allocation5 + $0x330] sm:$0xff] }
  0x85   : > { %519 = vmatprep.subr.mxu0 %v340_v60  ;;  %590 = vmatprep.subr.mxu1 %v342_v61  ;;  %v436_v28 = vld [vmem:[#allocation5 + $0x308] sm:$0xff]  ;;  %v438_v29 = vld [vmem:[#allocation5 + $0x318] sm:$0xff]  ;;  %v435_v30 = vld [vmem:[#allocation5 + $0x300] sm:$0xff] }
  0x86   : > { %520 = vmatpush1.msra.mxu0 %v339_v62  ;;  %591 = vmatpush1.msra.mxu1 %v341_v63  ;;  %v437_v31 = vld [vmem:[#allocation5 + $0x310] sm:$0xff]  ;;  %v432_v32 = vld [vmem:[#allocation5 + $0x2e8] sm:$0xff]  ;;  %v434_v33 = vld [vmem:[#allocation5 + $0x2f8] sm:$0xff] }
  0x87   : > { %521 = vmatprep.subr.mxu0 %v464_v0  ;;  %592 = vmatprep.subr.mxu1 %v466_v1  ;;  %v431_v34 = vld [vmem:[#allocation5 + $0x2e0] sm:$0xff]  ;;  %v433_v35 = vld [vmem:[#allocation5 + $0x2f0] sm:$0xff]  ;;  %v428_v36 = vld [vmem:[#allocation5 + $0x2c8] sm:$0xff] }
  0x88   : > { %522 = vmatpush2.msra.mxu0 %v463_v2  ;;  %593 = vmatpush2.msra.mxu1 %v465_v3  ;;  %v430_v37 = vld [vmem:[#allocation5 + $0x2d8] sm:$0xff]  ;;  %v427_v38 = vld [vmem:[#allocation5 + $0x2c0] sm:$0xff]  ;;  %v429_v39 = vld [vmem:[#allocation5 + $0x2d0] sm:$0xff] }
  0x89   : > { %523 = vmatprep.subr.mxu0 %v460_v4  ;;  %594 = vmatprep.subr.mxu1 %v462_v5  ;;  %v424_v40 = vld [vmem:[#allocation5 + $0x2a8] sm:$0xff]  ;;  %v426_v41 = vld [vmem:[#allocation5 + $0x2b8] sm:$0xff]  ;;  %v423_v42 = vld [vmem:[#allocation5 + $0x2a0] sm:$0xff] }
  0x8a   : > { %524 = vmatpush2.msra.mxu0 %v459_v6  ;;  %595 = vmatpush2.msra.mxu1 %v461_v7  ;;  %v425_v43 = vld [vmem:[#allocation5 + $0x2b0] sm:$0xff]  ;;  %v420_v44 = vld [vmem:[#allocation5 + $0x288] sm:$0xff]  ;;  %v422_v45 = vld [vmem:[#allocation5 + $0x298] sm:$0xff] }
  0x8b   : > { %525 = vmatprep.subr.mxu0 %v456_v8  ;;  %596 = vmatprep.subr.mxu1 %v458_v9  ;;  %v419_v46 = vld [vmem:[#allocation5 + $0x280] sm:$0xff]  ;;  %v421_v47 = vld [vmem:[#allocation5 + $0x290] sm:$0xff]  ;;  %v416_v48 = vld [vmem:[#allocation5 + $0x268] sm:$0xff] }
  0x8c   : > { %526 = vmatpush2.msra.mxu0 %v455_v10  ;;  %597 = vmatpush2.msra.mxu1 %v457_v11  ;;  %v418_v49 = vld [vmem:[#allocation5 + $0x278] sm:$0xff]  ;;  %v415_v50 = vld [vmem:[#allocation5 + $0x260] sm:$0xff]  ;;  %v417_v51 = vld [vmem:[#allocation5 + $0x270] sm:$0xff] }
  0x8d   : > { %527 = vmatprep.subr.mxu0 %v452_v12  ;;  %598 = vmatprep.subr.mxu1 %v454_v13  ;;  %v412_v52 = vld [vmem:[#allocation5 + $0x248] sm:$0xff]  ;;  %v414_v53 = vld [vmem:[#allocation5 + $0x258] sm:$0xff]  ;;  %v411_v54 = vld [vmem:[#allocation5 + $0x240] sm:$0xff] }
  0x8e   : > { %528 = vmatpush2.msra.mxu0 %v451_v14  ;;  %599 = vmatpush2.msra.mxu1 %v453_v15  ;;  %v413_v55 = vld [vmem:[#allocation5 + $0x250] sm:$0xff]  ;;  %v408_v56 = vld [vmem:[#allocation5 + $0x228] sm:$0xff]  ;;  %v410_v57 = vld [vmem:[#allocation5 + $0x238] sm:$0xff] }
  0x8f   : > { %529 = vmatprep.subr.mxu0 %v448_v16  ;;  %600 = vmatprep.subr.mxu1 %v450_v17  ;;  %v407_v58 = vld [vmem:[#allocation5 + $0x220] sm:$0xff]  ;;  %v409_v59 = vld [vmem:[#allocation5 + $0x230] sm:$0xff]  ;;  %v404_v60 = vld [vmem:[#allocation5 + $0x208] sm:$0xff] }
  0x90   : > { %530 = vmatpush2.msra.mxu0 %v447_v18  ;;  %601 = vmatpush2.msra.mxu1 %v449_v19  ;;  %v406_v61 = vld [vmem:[#allocation5 + $0x218] sm:$0xff]  ;;  %v403_v62 = vld [vmem:[#allocation5 + $0x200] sm:$0xff]  ;;  %v405_v0 = vld [vmem:[#allocation5 + $0x210] sm:$0xff] }
  0x91   : > { %531 = vmatprep.subr.mxu0 %v444_v20  ;;  %602 = vmatprep.subr.mxu1 %v446_v21  ;;  %v1563_v63 = vld [vmem:[%s1548_s2 + $0x8] sm:$0xff]  ;;  %v1566_v1 = vld [vmem:[%s1548_s2] sm:$0xff]  ;;  %s1293_s2 = scalar_lea.vmem %s984_s29, 256 }
  0x92   : > { %532 = vmatpush2.msra.mxu0 %v443_v22  ;;  %603 = vmatpush2.msra.mxu1 %v445_v23  ;;  %v666_v2 = vld [vmem:[#allocation8 + $0xf8] sm:$0xff]  ;;  %v665_v4 = vld [vmem:[#allocation8 + $0xf0] sm:$0xff]  ;;  %v664_v6 = vld [vmem:[#allocation8 + $0xe8] sm:$0xff]  ;;  %p1294_p4 = scmp.ne.s32.totalorder %s984_s29, %s1293_s2  ;;  %p1301_p3 = scmp.lt.s32.totalorder %s1299_s30, %s1293_s2 }
  0x93   : > { %533 = vmatprep.subr.mxu0 %v440_v24  ;;  %604 = vmatprep.subr.mxu1 %v442_v25  ;;  %v730_v3 = vld [vmem:[#allocation8 + $0x2f8] sm:$0xff]  ;;  %v729_v5 = vld [vmem:[#allocation8 + $0x2f0] sm:$0xff]  ;;  %v728_v7 = vld [vmem:[#allocation8 + $0x2e8] sm:$0xff] }
  0x94   : > { %534 = vmatpush2.msra.mxu0 %v439_v26  ;;  %605 = vmatpush2.msra.mxu1 %v441_v27  ;;  %v663_v8 = vld [vmem:[#allocation8 + $0xe0] sm:$0xff]  ;;  %v662_v10 = vld [vmem:[#allocation8 + $0xd8] sm:$0xff]  ;;  %v661_v12 = vld [vmem:[#allocation8 + $0xd0] sm:$0xff]  ;;  %p1295_p12 = pnand %p1294_p4, %p1667_p6  ;;  %p1302_p7 = por %p1301_p3, %p1300_p5 }
  0x95   : > { %535 = vmatprep.subr.mxu0 %v436_v28  ;;  %606 = vmatprep.subr.mxu1 %v438_v29  ;;  %v727_v9 = vld [vmem:[#allocation8 + $0x2e0] sm:$0xff]  ;;  %v726_v11 = vld [vmem:[#allocation8 + $0x2d8] sm:$0xff]  ;;  %v725_v13 = vld [vmem:[#allocation8 + $0x2d0] sm:$0xff] }
  0x96   : > { %536 = vmatpush2.msra.mxu0 %v435_v30  ;;  %607 = vmatpush2.msra.mxu1 %v437_v31  ;;  %v660_v14 = vld [vmem:[#allocation8 + $0xc8] sm:$0xff]  ;;  %v659_v16 = vld [vmem:[#allocation8 + $0xc0] sm:$0xff]  ;;  %v658_v18 = vld [vmem:[#allocation8 + $0xb8] sm:$0xff]  ;;  %p1296_p0 = pneg %p1295_p12 }
  0x97   : > { %537 = vmatprep.subr.mxu0 %v432_v32  ;;  %608 = vmatprep.subr.mxu1 %v434_v33  ;;  %v724_v15 = vld [vmem:[#allocation8 + $0x2c8] sm:$0xff]  ;;  %v723_v17 = vld [vmem:[#allocation8 + $0x2c0] sm:$0xff]  ;;  %v722_v19 = vld [vmem:[#allocation8 + $0x2b8] sm:$0xff] }
  0x98   : > { %538 = vmatpush2.msra.mxu0 %v431_v34  ;;  %609 = vmatpush2.msra.mxu1 %v433_v35  ;;  %v657_v20 = vld [vmem:[#allocation8 + $0xb0] sm:$0xff]  ;;  %v656_v22 = vld [vmem:[#allocation8 + $0xa8] sm:$0xff]  ;;  %v655_v24 = vld [vmem:[#allocation8 + $0xa0] sm:$0xff]  ;;  %p1303_p9 = pnand %p1302_p7, %p1296_p0 }
  0x99   : > { %539 = vmatprep.subr.mxu0 %v428_v36  ;;  %610 = vmatprep.subr.mxu1 %v430_v37  ;;  %v721_v21 = vld [vmem:[#allocation8 + $0x2b0] sm:$0xff]  ;;  %v720_v23 = vld [vmem:[#allocation8 + $0x2a8] sm:$0xff]  ;;  %v719_v25 = vld [vmem:[#allocation8 + $0x2a0] sm:$0xff] }
  0x9a   : > { %540 = vmatpush2.msra.mxu0 %v427_v38  ;;  %611 = vmatpush2.msra.mxu1 %v429_v39  ;;  %v654_v26 = vld [vmem:[#allocation8 + $0x98] sm:$0xff]  ;;  %v653_v28 = vld [vmem:[#allocation8 + $0x90] sm:$0xff]  ;;  %v652_v30 = vld [vmem:[#allocation8 + $0x88] sm:$0xff] }
  0x9b   : > { %541 = vmatprep.subr.mxu0 %v424_v40  ;;  %612 = vmatprep.subr.mxu1 %v426_v41  ;;  %v718_v27 = vld [vmem:[#allocation8 + $0x298] sm:$0xff]  ;;  %v717_v29 = vld [vmem:[#allocation8 + $0x290] sm:$0xff]  ;;  %v716_v31 = vld [vmem:[#allocation8 + $0x288] sm:$0xff] }
  0x9c   : > { %542 = vmatpush2.msra.mxu0 %v423_v42  ;;  %613 = vmatpush2.msra.mxu1 %v425_v43  ;;  %v651_v32 = vld [vmem:[#allocation8 + $0x80] sm:$0xff]  ;;  %v650_v34 = vld [vmem:[#allocation8 + $0x78] sm:$0xff]  ;;  %v649_v36 = vld [vmem:[#allocation8 + $0x70] sm:$0xff] }
  0x9d   : > { %543 = vmatprep.subr.mxu0 %v420_v44  ;;  %614 = vmatprep.subr.mxu1 %v422_v45  ;;  %v715_v33 = vld [vmem:[#allocation8 + $0x280] sm:$0xff]  ;;  %v714_v35 = vld [vmem:[#allocation8 + $0x278] sm:$0xff]  ;;  %v713_v37 = vld [vmem:[#allocation8 + $0x270] sm:$0xff] }
  0x9e   : > { %544 = vmatpush2.msra.mxu0 %v419_v46  ;;  %615 = vmatpush2.msra.mxu1 %v421_v47  ;;  %v648_v38 = vld [vmem:[#allocation8 + $0x68] sm:$0xff]  ;;  %v647_v40 = vld [vmem:[#allocation8 + $0x60] sm:$0xff]  ;;  %v646_v42 = vld [vmem:[#allocation8 + $0x58] sm:$0xff] }
  0x9f   : > { %545 = vmatprep.subr.mxu0 %v416_v48  ;;  %616 = vmatprep.subr.mxu1 %v418_v49  ;;  %v712_v39 = vld [vmem:[#allocation8 + $0x268] sm:$0xff]  ;;  %v711_v41 = vld [vmem:[#allocation8 + $0x260] sm:$0xff]  ;;  %v710_v43 = vld [vmem:[#allocation8 + $0x258] sm:$0xff] }
  0xa0   : > { %546 = vmatpush2.msra.mxu0 %v415_v50  ;;  %617 = vmatpush2.msra.mxu1 %v417_v51  ;;  %v645_v44 = vld [vmem:[#allocation8 + $0x50] sm:$0xff]  ;;  %v644_v46 = vld [vmem:[#allocation8 + $0x48] sm:$0xff]  ;;  %v643_v48 = vld [vmem:[#allocation8 + $0x40] sm:$0xff] }
  0xa1   : > { %547 = vmatprep.subr.mxu0 %v412_v52  ;;  %618 = vmatprep.subr.mxu1 %v414_v53  ;;  %v709_v45 = vld [vmem:[#allocation8 + $0x250] sm:$0xff]  ;;  %v708_v47 = vld [vmem:[#allocation8 + $0x248] sm:$0xff]  ;;  %v707_v49 = vld [vmem:[#allocation8 + $0x240] sm:$0xff] }
  0xa2   : > { %548 = vmatpush2.msra.mxu0 %v411_v54  ;;  %619 = vmatpush2.msra.mxu1 %v413_v55  ;;  %v642_v50 = vld [vmem:[#allocation8 + $0x38] sm:$0xff]  ;;  %v641_v52 = vld [vmem:[#allocation8 + $0x30] sm:$0xff]  ;;  %v640_v54 = vld [vmem:[#allocation8 + $0x28] sm:$0xff] }
  0xa3   : > { %549 = vmatprep.subr.mxu0 %v408_v56  ;;  %620 = vmatprep.subr.mxu1 %v410_v57  ;;  %v706_v51 = vld [vmem:[#allocation8 + $0x238] sm:$0xff]  ;;  %v705_v53 = vld [vmem:[#allocation8 + $0x230] sm:$0xff]  ;;  %v704_v55 = vld [vmem:[#allocation8 + $0x228] sm:$0xff] }
  0xa4   : > { %550 = vmatpush2.msra.mxu0 %v407_v58  ;;  %621 = vmatpush2.msra.mxu1 %v409_v59  ;;  %v639_v56 = vld [vmem:[#allocation8 + $0x20] sm:$0xff]  ;;  %v638_v58 = vld [vmem:[#allocation8 + $0x18] sm:$0xff] }
  0xa5   : > { %551 = vmatprep.subr.mxu0 %v404_v60  ;;  %622 = vmatprep.subr.mxu1 %v406_v61  ;;  %v703_v57 = vld [vmem:[#allocation8 + $0x220] sm:$0xff]  ;;  %v702_v59 = vld [vmem:[#allocation8 + $0x218] sm:$0xff]  ;;  %v637_v60 = vld [vmem:[#allocation8 + $0x10] sm:$0xff] }
  0xa6   : > { %552 = vmatpush2.msra.mxu0 %v403_v62  ;;  %553 = vmatprep.mubr.f32.mxu0 %v1563_v63  ;;  %v701_v61 = vld [vmem:[#allocation8 + $0x210] sm:$0xff]  ;;  %v636_v62 = vld [vmem:[#allocation8 + $0x8] sm:$0xff] }
  0xa7   : > { %623 = vmatpush2.msra.mxu1 %v405_v0  ;;  %624 = vmatprep.mubr.f32.mxu1 %v1563_v63  ;;  %v700_v0 = vld [vmem:[#allocation8 + $0x208] sm:$0xff] }
  0xa8   : > { %554 = vmatmul.mubr.f32.vlgmr.msra.gmra.mxu0 %v1566_v1  ;;  %625 = vmatmul.mubr.f32.vlgmr.msra.gmra.mxu1 %v1566_v1 }
  0xa9   : > { %775 = vmatprep.subr.mxu0 %v666_v2  ;;  %846 = vmatprep.subr.mxu1 %v730_v3  ;;  %v635_v2 = vld [vmem:[#allocation8] sm:$0xff] }
  0xaa   : > { %776 = vmatpush1.msra.mxu0 %v665_v4  ;;  %847 = vmatpush1.msra.mxu1 %v729_v5  ;;  %v699_v3 = vld [vmem:[#allocation8 + $0x200] sm:$0xff]  ;;  %v698_v4 = vld [vmem:[#allocation8 + $0x1f8] sm:$0xff] }
  0xab   : > { %777 = vmatprep.subr.mxu0 %v664_v6  ;;  %848 = vmatprep.subr.mxu1 %v728_v7  ;;  %v762_v5 = vld [vmem:[#allocation8 + $0x3f8] sm:$0xff]  ;;  %v697_v6 = vld [vmem:[#allocation8 + $0x1f0] sm:$0xff] }
  0xac   : > { %778 = vmatpush1.msra.mxu0 %v663_v8  ;;  %849 = vmatpush1.msra.mxu1 %v727_v9  ;;  %v761_v7 = vld [vmem:[#allocation8 + $0x3f0] sm:$0xff]  ;;  %v696_v8 = vld [vmem:[#allocation8 + $0x1e8] sm:$0xff] }
  0xad   : > { %779 = vmatprep.subr.mxu0 %v662_v10  ;;  %850 = vmatprep.subr.mxu1 %v726_v11  ;;  %v760_v9 = vld [vmem:[#allocation8 + $0x3e8] sm:$0xff]  ;;  %v695_v10 = vld [vmem:[#allocation8 + $0x1e0] sm:$0xff] }
  0xae   : > { %780 = vmatpush1.msra.mxu0 %v661_v12  ;;  %851 = vmatpush1.msra.mxu1 %v725_v13  ;;  %v759_v11 = vld [vmem:[#allocation8 + $0x3e0] sm:$0xff]  ;;  %v694_v12 = vld [vmem:[#allocation8 + $0x1d8] sm:$0xff] }
  0xaf   : > { %781 = vmatprep.subr.mxu0 %v660_v14  ;;  %852 = vmatprep.subr.mxu1 %v724_v15  ;;  %v758_v13 = vld [vmem:[#allocation8 + $0x3d8] sm:$0xff]  ;;  %v693_v14 = vld [vmem:[#allocation8 + $0x1d0] sm:$0xff] }
  0xb0   : > { %782 = vmatpush1.msra.mxu0 %v659_v16  ;;  %853 = vmatpush1.msra.mxu1 %v723_v17  ;;  %v757_v15 = vld [vmem:[#allocation8 + $0x3d0] sm:$0xff]  ;;  %v692_v16 = vld [vmem:[#allocation8 + $0x1c8] sm:$0xff] }
  0xb1   : > { %783 = vmatprep.subr.mxu0 %v658_v18  ;;  %854 = vmatprep.subr.mxu1 %v722_v19  ;;  %v756_v17 = vld [vmem:[#allocation8 + $0x3c8] sm:$0xff]  ;;  %v691_v18 = vld [vmem:[#allocation8 + $0x1c0] sm:$0xff] }
  0xb2   : > { %784 = vmatpush1.msra.mxu0 %v657_v20  ;;  %855 = vmatpush1.msra.mxu1 %v721_v21  ;;  %v755_v19 = vld [vmem:[#allocation8 + $0x3c0] sm:$0xff]  ;;  %v690_v20 = vld [vmem:[#allocation8 + $0x1b8] sm:$0xff] }
  0xb3   : > { %785 = vmatprep.subr.mxu0 %v656_v22  ;;  %856 = vmatprep.subr.mxu1 %v720_v23  ;;  %v754_v21 = vld [vmem:[#allocation8 + $0x3b8] sm:$0xff]  ;;  %v689_v22 = vld [vmem:[#allocation8 + $0x1b0] sm:$0xff] }
  0xb4   : > { %786 = vmatpush1.msra.mxu0 %v655_v24  ;;  %857 = vmatpush1.msra.mxu1 %v719_v25  ;;  %v753_v23 = vld [vmem:[#allocation8 + $0x3b0] sm:$0xff]  ;;  %v688_v24 = vld [vmem:[#allocation8 + $0x1a8] sm:$0xff] }
  0xb5   : > { %787 = vmatprep.subr.mxu0 %v654_v26  ;;  %858 = vmatprep.subr.mxu1 %v718_v27  ;;  %v752_v25 = vld [vmem:[#allocation8 + $0x3a8] sm:$0xff]  ;;  %v687_v26 = vld [vmem:[#allocation8 + $0x1a0] sm:$0xff] }
  0xb6   : > { %788 = vmatpush1.msra.mxu0 %v653_v28  ;;  %859 = vmatpush1.msra.mxu1 %v717_v29  ;;  %v751_v27 = vld [vmem:[#allocation8 + $0x3a0] sm:$0xff]  ;;  %v686_v28 = vld [vmem:[#allocation8 + $0x198] sm:$0xff] }
  0xb7   : > { %789 = vmatprep.subr.mxu0 %v652_v30  ;;  %860 = vmatprep.subr.mxu1 %v716_v31  ;;  %v750_v29 = vld [vmem:[#allocation8 + $0x398] sm:$0xff]  ;;  %v685_v30 = vld [vmem:[#allocation8 + $0x190] sm:$0xff] }
  0xb8   : > { %790 = vmatpush1.msra.mxu0 %v651_v32  ;;  %861 = vmatpush1.msra.mxu1 %v715_v33  ;;  %v749_v31 = vld [vmem:[#allocation8 + $0x390] sm:$0xff]  ;;  %v684_v32 = vld [vmem:[#allocation8 + $0x188] sm:$0xff] }
  0xb9   : > { %791 = vmatprep.subr.mxu0 %v650_v34  ;;  %862 = vmatprep.subr.mxu1 %v714_v35  ;;  %v748_v33 = vld [vmem:[#allocation8 + $0x388] sm:$0xff]  ;;  %v683_v34 = vld [vmem:[#allocation8 + $0x180] sm:$0xff] }
  0xba   : > { %792 = vmatpush1.msra.mxu0 %v649_v36  ;;  %863 = vmatpush1.msra.mxu1 %v713_v37  ;;  %v747_v35 = vld [vmem:[#allocation8 + $0x380] sm:$0xff]  ;;  %v682_v36 = vld [vmem:[#allocation8 + $0x178] sm:$0xff] }
  0xbb   : > { %793 = vmatprep.subr.mxu0 %v648_v38  ;;  %864 = vmatprep.subr.mxu1 %v712_v39  ;;  %v746_v37 = vld [vmem:[#allocation8 + $0x378] sm:$0xff]  ;;  %v681_v38 = vld [vmem:[#allocation8 + $0x170] sm:$0xff] }
  0xbc   : > { %794 = vmatpush1.msra.mxu0 %v647_v40  ;;  %865 = vmatpush1.msra.mxu1 %v711_v41  ;;  %v745_v39 = vld [vmem:[#allocation8 + $0x370] sm:$0xff]  ;;  %v680_v40 = vld [vmem:[#allocation8 + $0x168] sm:$0xff] }
  0xbd   : > { %795 = vmatprep.subr.mxu0 %v646_v42  ;;  %866 = vmatprep.subr.mxu1 %v710_v43  ;;  %v744_v41 = vld [vmem:[#allocation8 + $0x368] sm:$0xff]  ;;  %v679_v42 = vld [vmem:[#allocation8 + $0x160] sm:$0xff] }
  0xbe   : > { %796 = vmatpush1.msra.mxu0 %v645_v44  ;;  %867 = vmatpush1.msra.mxu1 %v709_v45  ;;  %v743_v43 = vld [vmem:[#allocation8 + $0x360] sm:$0xff]  ;;  %v678_v44 = vld [vmem:[#allocation8 + $0x158] sm:$0xff] }
  0xbf   : > { %797 = vmatprep.subr.mxu0 %v644_v46  ;;  %868 = vmatprep.subr.mxu1 %v708_v47  ;;  %v742_v45 = vld [vmem:[#allocation8 + $0x358] sm:$0xff]  ;;  %v677_v46 = vld [vmem:[#allocation8 + $0x150] sm:$0xff] }
  0xc0   : > { %798 = vmatpush1.msra.mxu0 %v643_v48  ;;  %869 = vmatpush1.msra.mxu1 %v707_v49  ;;  %v741_v47 = vld [vmem:[#allocation8 + $0x350] sm:$0xff]  ;;  %v676_v48 = vld [vmem:[#allocation8 + $0x148] sm:$0xff] }
  0xc1   : > { %799 = vmatprep.subr.mxu0 %v642_v50  ;;  %870 = vmatprep.subr.mxu1 %v706_v51  ;;  %v740_v49 = vld [vmem:[#allocation8 + $0x348] sm:$0xff]  ;;  %v675_v50 = vld [vmem:[#allocation8 + $0x140] sm:$0xff] }
  0xc2   : > { %800 = vmatpush1.msra.mxu0 %v641_v52  ;;  %871 = vmatpush1.msra.mxu1 %v705_v53  ;;  %v739_v51 = vld [vmem:[#allocation8 + $0x340] sm:$0xff]  ;;  %v674_v52 = vld [vmem:[#allocation8 + $0x138] sm:$0xff] }
  0xc3   : > { %801 = vmatprep.subr.mxu0 %v640_v54  ;;  %872 = vmatprep.subr.mxu1 %v704_v55  ;;  %v738_v53 = vld [vmem:[#allocation8 + $0x338] sm:$0xff]  ;;  %v673_v54 = vld [vmem:[#allocation8 + $0x130] sm:$0xff] }
  0xc4   : > { %802 = vmatpush1.msra.mxu0 %v639_v56  ;;  %873 = vmatpush1.msra.mxu1 %v703_v57  ;;  %v737_v55 = vld [vmem:[#allocation8 + $0x330] sm:$0xff]  ;;  %v672_v56 = vld [vmem:[#allocation8 + $0x128] sm:$0xff] }
  0xc5   : > { %803 = vmatprep.subr.mxu0 %v638_v58  ;;  %874 = vmatprep.subr.mxu1 %v702_v59  ;;  %v736_v57 = vld [vmem:[#allocation8 + $0x328] sm:$0xff]  ;;  %v671_v58 = vld [vmem:[#allocation8 + $0x120] sm:$0xff] }
  0xc6   : > { %804 = vmatpush1.msra.mxu0 %v637_v60  ;;  %875 = vmatpush1.msra.mxu1 %v701_v61  ;;  %v735_v59 = vld [vmem:[#allocation8 + $0x320] sm:$0xff]  ;;  %v670_v60 = vld [vmem:[#allocation8 + $0x118] sm:$0xff] }
  0xc7   : > { %805 = vmatprep.subr.mxu0 %v636_v62  ;;  %876 = vmatprep.subr.mxu1 %v700_v0  ;;  %v734_v61 = vld [vmem:[#allocation8 + $0x318] sm:$0xff]  ;;  %v669_v62 = vld [vmem:[#allocation8 + $0x110] sm:$0xff] }
  0xc8   : > { %806 = vmatpush1.msra.mxu0 %v635_v2  ;;  %877 = vmatpush1.msra.mxu1 %v699_v3  ;;  %v733_v0 = vld [vmem:[#allocation8 + $0x310] sm:$0xff]  ;;  %v668_v2 = vld [vmem:[#allocation8 + $0x108] sm:$0xff] }
  0xc9   : > { %807 = vmatprep.subr.mxu0 %v698_v4  ;;  %878 = vmatprep.subr.mxu1 %v762_v5  ;;  %v732_v3 = vld [vmem:[#allocation8 + $0x308] sm:$0xff]  ;;  %v667_v4 = vld [vmem:[#allocation8 + $0x100] sm:$0xff] }
  0xca   : > { %808 = vmatpush2.msra.mxu0 %v697_v6  ;;  %879 = vmatpush2.msra.mxu1 %v761_v7  ;;  %v731_v5 = vld [vmem:[#allocation8 + $0x300] sm:$0xff]  ;;  %v469_v6 = vlaneseq }
  0xcb   : > { %809 = vmatprep.subr.mxu0 %v696_v8  ;;  %880 = vmatprep.subr.mxu1 %v760_v9 }
  0xcc   : > { %810 = vmatpush2.msra.mxu0 %v695_v10  ;;  %881 = vmatpush2.msra.mxu1 %v759_v11  ;;  %v470_v7 = vshrl.u32 %v469_v6, 7  ;;  %v467_v10 = vld [vmem:[#allocation7] sm:$0xf] }
  0xcd   : > { %811 = vmatprep.subr.mxu0 %v694_v12  ;;  %882 = vmatprep.subr.mxu1 %v758_v13 }
  0xce   : > { %812 = vmatpush2.msra.mxu0 %v693_v14  ;;  %883 = vmatpush2.msra.mxu1 %v757_v15  ;;  %v479_v8 = vsub.s32 2, %v470_v7  ;;  %v1572_v9 = vsub.s32 0, %v470_v7  ;;  %v1574_v11 = vsub.s32 1, %v470_v7  ;;  %v483_v12 = vsub.s32 3, %v470_v7 }
  0xcf   : > { %813 = vmatprep.subr.mxu0 %v692_v16  ;;  %884 = vmatprep.subr.mxu1 %v756_v17 }
  0xd0   : > { %814 = vmatpush2.msra.mxu0 %v691_v18  ;;  %885 = vmatpush2.msra.mxu1 %v755_v19  ;;  %v480_v13 = vrot.slane %v467_v10, %v479_v8  ;;  %v472_v14 = vrot.slane %v467_v10, %v1572_v9  ;;  %v476_v15 = vrot.slane %v467_v10, %v1574_v11 }
  0xd1   : > { %815 = vmatprep.subr.mxu0 %v690_v20  ;;  %886 = vmatprep.subr.mxu1 %v754_v21  ;;  %v484_v16 = vrot.slane %v467_v10, %v483_v12 }
  0xd2   : > { %816 = vmatpush2.msra.mxu0 %v689_v22  ;;  %887 = vmatpush2.msra.mxu1 %v753_v23 }
  0xd3   : > { %817 = vmatprep.subr.mxu0 %v688_v24  ;;  %888 = vmatprep.subr.mxu1 %v752_v25 }
  0xd4   : > { %818 = vmatpush2.msra.mxu0 %v687_v26  ;;  %889 = vmatpush2.msra.mxu1 %v751_v27 }
  0xd5   : > { %819 = vmatprep.subr.mxu0 %v686_v28  ;;  %890 = vmatprep.subr.mxu1 %v750_v29  ;;  %v763_v29 = vld [vmem:[%s1642_s4] sm:$0x3] }
  0xd6   : > { %820 = vmatpush2.msra.mxu0 %v685_v30  ;;  %891 = vmatpush2.msra.mxu1 %v749_v31  ;;  %v768_v30 = vrot.slane %v763_v29, %v1572_v9  ;;  %v772_v31 = vrot.slane %v763_v29, %v1574_v11 }
  0xd7   : > { %821 = vmatprep.subr.mxu0 %v684_v32  ;;  %892 = vmatprep.subr.mxu1 %v748_v33 }
  0xd8   : > { %822 = vmatpush2.msra.mxu0 %v683_v34  ;;  %893 = vmatpush2.msra.mxu1 %v747_v35 }
  0xd9   : > { %823 = vmatprep.subr.mxu0 %v682_v36  ;;  %894 = vmatprep.subr.mxu1 %v746_v37 }
  0xda   : > { %824 = vmatpush2.msra.mxu0 %v681_v38  ;;  %895 = vmatpush2.msra.mxu1 %v745_v39 }
  0xdb   : > { %825 = vmatprep.subr.mxu0 %v680_v40  ;;  %896 = vmatprep.subr.mxu1 %v744_v41 }
  0xdc   : > { %826 = vmatpush2.msra.mxu0 %v679_v42  ;;  %897 = vmatpush2.msra.mxu1 %v743_v43 }
  0xdd   : > { %827 = vmatprep.subr.mxu0 %v678_v44  ;;  %898 = vmatprep.subr.mxu1 %v742_v45 }
  0xde   : > { %828 = vmatpush2.msra.mxu0 %v677_v46  ;;  %899 = vmatpush2.msra.mxu1 %v741_v47 }
  0xdf   : > { %829 = vmatprep.subr.mxu0 %v676_v48  ;;  %900 = vmatprep.subr.mxu1 %v740_v49 }
  0xe0   : > { %830 = vmatpush2.msra.mxu0 %v675_v50  ;;  %901 = vmatpush2.msra.mxu1 %v739_v51 }
  0xe1   : > { %831 = vmatprep.subr.mxu0 %v674_v52  ;;  %902 = vmatprep.subr.mxu1 %v738_v53 }
  0xe2   : > { %832 = vmatpush2.msra.mxu0 %v673_v54  ;;  %903 = vmatpush2.msra.mxu1 %v737_v55 }
  0xe3   : > { %833 = vmatprep.subr.mxu0 %v672_v56  ;;  %904 = vmatprep.subr.mxu1 %v736_v57 }
  0xe4   : > { %834 = vmatpush2.msra.mxu0 %v671_v58  ;;  %905 = vmatpush2.msra.mxu1 %v735_v59 }
  0xe5   : > { %835 = vmatprep.subr.mxu0 %v670_v60  ;;  %906 = vmatprep.subr.mxu1 %v734_v61 }
  0xe6   : > { %836 = vmatpush2.msra.mxu0 %v669_v62  ;;  %907 = vmatpush2.msra.mxu1 %v733_v0 }
  0xe7   : > { %837 = vmatprep.subr.mxu0 %v668_v2  ;;  %908 = vmatprep.subr.mxu1 %v732_v3 }
  0xe8   : > { %838 = vmatpush2.msra.mxu0 %v667_v4  ;;  %909 = vmatpush2.msra.mxu1 %v731_v5 }
 0x168   : > { %v555_v17 = vpop.f32.mrf.mxu0  ;;  %v626_v18 = vpop.f32.mrf.mxu1 }
 0x169   : > { %v627_v19 = vadd.f32 %v626_v18, %v480_v13  ;;  %v556_v20 = vadd.f32 %v555_v17, %v472_v14 }
 0x16a   : > { %v557_v21 = vpop.f32.mrf.mxu0  ;;  %v628_v22 = vpop.f32.mrf.mxu1 }
 0x16b   : > { %v558_v23 = vadd.f32 %v557_v21, %v476_v15  ;;  %v629_v24 = vadd.f32 %v628_v22, %v484_v16  ;;  %v633_v25 = vmax.f32 %v627_v19, 0.0  ;;  %v631_v28 = vmax.f32 %v556_v20, 0.0 }
 0x16d   : > { %v632_v26 = vmax.f32 %v558_v23, 0.0  ;;  %v634_v27 = vmax.f32 %v629_v24, 0.0 }
 0x16f   : > { %839 = vmatprep.mubr.f32.mxu0 %v632_v26  ;;  %910 = vmatprep.mubr.f32.mxu1 %v634_v27 }
 0x170   : > { %840 = vmatmul.mubr.f32.vlgmr.msra.gmra.mxu0 %v631_v28  ;;  %911 = vmatmul.mubr.f32.vlgmr.msra.gmra.mxu1 %v633_v25 }
 0x230   : > { %v841_v32 = vpop.f32.mrf.mxu0  ;;  %v912_v33 = vpop.f32.mrf.mxu1 }
 0x231   : > { %v842_v34 = vadd.f32 %v841_v32, %v768_v30 }
 0x232   : > { %v843_v35 = vpop.f32.mrf.mxu0  ;;  %v914_v38 = vpop.f32.mrf.mxu1 }
 0x233   : > { %v913_v36 = vadd.f32 %v912_v33, %v842_v34  ;;  %v844_v37 = vadd.f32 %v843_v35, %v772_v31 }
 0x235   : > { %v915_v39 = vadd.f32 %v914_v38, %v844_v37  ;;  %v917_v40 = vadd.f32 %v913_v36, %v1566_v1  ;;  %v952_v1 = vld [vmem:[%s1644_s6] sm:$0x3] }
 0x236   : > { %v957_v61 = vrot.slane %v952_v1, %v1572_v9  ;;  %v961_v62 = vrot.slane %v952_v1, %v1574_v11 }
 0x237   : > { %v918_v41 = vadd.f32 %v915_v39, %v1563_v63  ;;  %v923_v44 = vmul.f32 %v917_v40, %v917_v40  ;;  %v938_v63 = vld [vmem:[%s1643_s5] sm:$0x3] }
 0x238   : > { %v943_v56 = vrot.slane %v938_v63, %v1572_v9  ;;  %v947_v57 = vrot.slane %v938_v63, %v1574_v11 }
 0x239   : > { %v919_v42 = vadd.f32 %v918_v41, %v917_v40  ;;  %v924_v43 = vmul.f32 %v918_v41, %v918_v41 }
 0x23b   : > { %920 = vadd.xlane.f32.xlu0 %v919_v42  ;;  %v925_v45 = vadd.f32 %v924_v43, %v923_v44 }
 0x23f   : > { %926 = vadd.xlane.f32.xlu0 %v925_v45 }
 0x2c4   : > { %v921_v46 = vpop.xlane.xlu0 %920 }
 0x2c5   : > { %v922_v47 = vmul.f32 0.00390625, %v921_v46 }
 0x2c7   : > { %v929_v49 = vmul.f32 %v922_v47, %v922_v47  ;;  %v932_v54 = vsub.f32 %v917_v40, %v922_v47  ;;  %v933_v55 = vsub.f32 %v918_v41, %v922_v47 }
 0x2c8   : > { %v927_v48 = vpop.xlane.xlu0 %926 }
 0x2c9   : > { %v928_v50 = vmul.f32 0.00390625, %v927_v48 }
 0x2cb   : > { %v930_v51 = vsub.f32 %v928_v50, %v929_v49 }
 0x2cd   : > { %v931_v52 = vmax.f32 %v930_v51, 0.0 }
 0x2cf   : > { %v934_v53 = vadd.f32 1e-05, %v931_v52 }
 0x2d1   : > { %1185 = vrsqrt.f32 %v934_v53 }
 0x2de   : > { %v1186_v58 = vpop.eup %1185 }
 0x2df   : > { %v936_v59 = vmul.f32 %v1186_v58, %v932_v54  ;;  %v937_v60 = vmul.f32 %v1186_v58, %v933_v55 }
 0x2e1   : > { %v950_v0 = vmul.f32 %v943_v56, %v936_v59  ;;  %v951_v2 = vmul.f32 %v947_v57, %v937_v60 }
 0x2e3   : > { %v964_v3 = vadd.f32 %v957_v61, %v950_v0  ;;  %v965_v4 = vadd.f32 %v961_v62, %v951_v2 }
 0x2e5   : > { %966 = vst [vmem:[%s336_s23] sm:$0xff] %v964_v3  ;;  %967 = vst [vmem:[%s336_s23 + $0x8] sm:$0xff] %v965_v4 }
 0x2e6   : > { %1306 = shalt.err (!%p1303_p9)
}
 0x2e7   : > { %s1307_s9 = scalar_lea.hbm %s1601_s12, 256  ;;  %s1311_s13 = scalar_lea.hbm %s1645_s7, 512 }
 0x2e8   : > { %p1308_p13 = scmp.ne.s32.totalorder %s1601_s12, %s1307_s9  ;;  %p1312_p11 = scmp.lt.s32.totalorder %s1601_s12, %s1645_s7 }
 0x2e9   : > { %p1313_p1 = scmp.lt.s32.totalorder %s1311_s13, %s1307_s9 }
 0x2ea   : > { %p1309_p8 = pnand %p1308_p13, %p1667_p6 }
 0x2eb   : > { %p1314_p2 = por %p1313_p1, %p1312_p11 }
 0x2ec   : > { %p1310_p10 = pneg %p1309_p8 }
 0x2ee   : > { %p1315_p4 = pnand %p1314_p2, %p1310_p10 }
 0x2f0   : > { %1318 = shalt.err (!%p1315_p4)
}
 0x2f1   : > { %1118 = dma.vmem_to_hbm [thread:$0]  (%p1667_p6), %s984_s29, 256, %s1601_s12, %s969_s1  }
 0x2f2 PF: > { %s995_s22 = sand.u32 1, %s1353_s24   ;;  %p1668_p12 = scmp.ne.s32.totalorder %s1653_s8, 0 }
 0x2f3   : > { %p1669_p0 = scmp.ge.s32.totalorder %s1365_s27, 2  ;;  %s996_s23 = scalar_lea.sflag [#allocation4], %s995_s22 }
 0x2f5   : > { %p1135_p5 = pnand %p1669_p0, %p1668_p12 }
 0x2f7   : > { %p1136_p3 = pneg %p1135_p5 }
 0x2f9   : > { %1348 = dma.done.wait (%p1136_p3), %s996_s23, 256  }
 0x2fa   : > { %1350 = vsyncadd (%p1136_p3), %s996_s23, 4294967040  ;;  %p22_p7 = scmp.ge.s32.totalorder %s1496_s17, 4   ;;  %s1670_s24 = smov %s1357_s25 }
 0x2fb   : > { %s1671_s25 = smov %s1361_s26  ;;  %s1672_s26 = smov %s1506_s20 }
 0x2fc   : > { %s1673_s27 = smov %s1496_s17  ;;  %24 = sbr.rel (!%p22_p7) target bundleno = 10 (0xa), region = 105 }
 0x301   :  { %1001 = vsyncpa [#allocation3], 1 }
 0x302   :  { %1003 = vsyncpa [#allocation3 + $0x1], 1 }
 0x303   :  { %1004 = vsyncpa [#allocation6], 1 }
 0x304   :  { %1005 = vsyncpa [#allocation9], 1 }
 0x305   :  { %1006 = vsyncpa [#allocation4], 1 }
 0x306   :  { %1008 = vsyncpa [#allocation4 + $0x1], 1 }

</bundles_post_ra>
